<compile_context>
chip_gen: v7x
topology: tpu7x:2x2x1
jax: 0.10.0
libtpu: 0.0.40
codegen_flags: <defaults>
</compile_context>

<pallas_src>
from functools import partial

import jax
import jax.numpy as jnp
from jax.experimental import pallas as pl
from jax.experimental.pallas import tpu as pltpu


def _round_up(x, m):
    return ((x + m - 1) // m) * m


def _conv_tile(x_ref, w_ref, xpad_ref, col_ref, *, Nb, Cin, H, W, Wp, Lout, KH, KW,
               mxu_dtype):
    """Fused 3x3 conv on Nb images -> (Cout, Nb*Lout) f32.

    x_ref:    (Nb, Cin, H, W)         raw (unpadded) input block, f32.
    w_ref:    (Cout, KH*KW*Cin)       tap-major reshaped weights (mxu_dtype).
    xpad_ref: (Nb, Cin, Lpad) f32     zero-padded, row-flattened image scratch.
    col_ref:  (KH*KW*Cin, Nb*Lout)    im2col scratch (mxu_dtype).
    """
    # In-kernel zero padding: memset the padded scratch (cheap VMEM memset, done every
    # step so correctness does not depend on which TensorCore ran step 0), then copy
    # the H real rows of each image to lane offset (h+1)*Wp + 1.
    xpad_ref[...] = jnp.zeros_like(xpad_ref)
    for n in range(Nb):
        for h in range(H):
            base = (h + 1) * Wp + 1
            xpad_ref[n, :, base:base + W] = x_ref[n, :, h, :]

    # Build the (KH*KW*Cin, Nb*Lout) im2col tile: tap (kh, kw) of image n is the
    # lane-shifted window xpad[n, :, off:off+Lout] with off = kh*Wp + kw.
    for n in range(Nb):
        for kh in range(KH):
            for kw in range(KW):
                t = kh * KW + kw
                off = kh * Wp + kw
                col_ref[t * Cin:(t + 1) * Cin, n * Lout:(n + 1) * Lout] = (
                    xpad_ref[n, :, off:off + Lout].astype(mxu_dtype))

    # Single MXU contraction over K = KH*KW*Cin, f32 accumulation.
    return jnp.dot(w_ref[...], col_ref[...], preferred_element_type=jnp.float32)


def conv_stats_kernel(x_ref, w_ref, mask_ref, stats_ref, xpad_ref, col_ref, *,
                      Nb, Cin, H, W, Wp, Lout, KH, KW, mxu_dtype):
    """Fused conv + per-step partial per-channel sum / sum-of-squares (valid cols)."""
    acc = _conv_tile(x_ref, w_ref, xpad_ref, col_ref, Nb=Nb, Cin=Cin, H=H, W=W,
                     Wp=Wp, Lout=Lout, KH=KH, KW=KW, mxu_dtype=mxu_dtype)
    m = mask_ref[...]                               # (1, Nb*Lout) 1/0 on valid columns
    ym = acc * m
    stats_ref[0, :, 0:1] = jnp.sum(ym, axis=1, keepdims=True)        # sum
    stats_ref[0, :, 1:2] = jnp.sum(ym * acc, axis=1, keepdims=True)  # sum of squares


def conv_bn_relu_kernel(x_ref, w_ref, scale_ref, shift_ref, o_ref, xpad_ref, col_ref, *,
                        Nb, Cin, H, W, Wp, Lout, KH, KW, mxu_dtype):
    """Fused conv recompute + folded BN affine + ReLU, lane-dense channel-major out."""
    acc = _conv_tile(x_ref, w_ref, xpad_ref, col_ref, Nb=Nb, Cin=Cin, H=H, W=W,
                     Wp=Wp, Lout=Lout, KH=KH, KW=KW, mxu_dtype=mxu_dtype)
    y = jnp.maximum(acc * scale_ref[...] + shift_ref[...], 0.0)      # (Cout, Nb*Lout)
    for n in range(Nb):
        o_ref[n] = y[:, n * Lout:(n + 1) * Lout].astype(o_ref.dtype)


def conv_block_forward(x_nchw, w_oihw, bias, gamma, beta, eps=1e-5,
                       mxu_dtype=jnp.bfloat16):
    """ConvBlock forward. x_nchw: [N, Cin, H, W] (kernel=3, stride=1, padding=1)."""
    del bias  # cancels exactly against the training-mode BN batch mean (see header)
    N, Cin, H, W = x_nchw.shape
    Cout, _, KH, KW = w_oihw.shape
    pad = 1
    Wp = W + 2 * pad
    L = H * Wp                                       # valid+wrap output columns/image
    Lout = _round_up(L, 128)                         # lane-dense output width
    Lpad = _round_up((KH - 1) * Wp + (KW - 1) + Lout, 128)  # padded-scratch extent
    K9 = KH * KW * Cin

    # Images per grid step: enough lanes per step to amortize the ~0.35us step cost,
    # but keep >= 2 grid steps whenever N >= 2 (v7x dual TensorCore).
    LANE_TARGET = 2048
    Nb = max(1, min(N, -(-LANE_TARGET // Lout)))
    if N >= 2:
        Nb = max(1, min(Nb, N // 2))
    Ng = -(-N // Nb)
    Npad = Ng * Nb

    x = x_nchw.astype(jnp.float32)
    if Npad != N:
        # zero-padded images contribute nothing to the masked statistics
        x = jnp.pad(x, ((0, Npad - N), (0, 0), (0, 0), (0, 0)))

    # Tap-major weight relayout: K index = (kh*KW + kw)*Cin + cin  (matches im2col).
    w9 = jnp.transpose(w_oihw.astype(jnp.float32), (0, 2, 3, 1)).reshape(Cout, K9)
    w9 = w9.astype(mxu_dtype)

    # Valid-output-column mask (1, Nb*Lout): column p of an image is valid iff
    # p < L and (p % Wp) < W.  Built in JAX (tiny) rather than via in-kernel integer
    # remainder on vectors.
    p = jnp.arange(Lout, dtype=jnp.int32)
    m1 = ((p % Wp < W) & (p < L)).astype(jnp.float32)
    mask = jnp.tile(m1, (Nb,)).reshape(1, Nb * Lout)

    cparams = pltpu.CompilerParams(dimension_semantics=("parallel",))
    scratches = [pltpu.VMEM((Nb, Cin, Lpad), jnp.float32),
                 pltpu.VMEM((K9, Nb * Lout), mxu_dtype)]
    statics = dict(Nb=Nb, Cin=Cin, H=H, W=W, Wp=Wp, Lout=Lout, KH=KH, KW=KW,
                   mxu_dtype=mxu_dtype)

    # ---- Pallas kernel 1: fused conv + per-step partial batch statistics ----
    stats = pl.pallas_call(
        partial(conv_stats_kernel, **statics),
        out_shape=jax.ShapeDtypeStruct((Ng, Cout, 2), jnp.float32),
        grid_spec=pltpu.PrefetchScalarGridSpec(
            num_scalar_prefetch=0,
            grid=(Ng,),
            in_specs=[pl.BlockSpec((Nb, Cin, H, W), lambda g: (g, 0, 0, 0)),
                      pl.BlockSpec((Cout, K9), lambda g: (0, 0)),
                      pl.BlockSpec((1, Nb * Lout), lambda g: (0, 0))],
            out_specs=pl.BlockSpec((1, Cout, 2), lambda g: (g, 0, 0)),
            scratch_shapes=scratches),
        compiler_params=cparams,
    )(x, w9, mask)

    # ---- tiny JAX epilogue: reduce partials, fold BN (training-mode batch stats) ----
    count = jnp.float32(N * H * W)
    csum = jnp.sum(stats[:, :, 0], axis=0)                            # (Cout,)
    csumsq = jnp.sum(stats[:, :, 1], axis=0)
    mean = csum / count
    # TODO(synk): E[y^2]-E[y]^2 can cancel catastrophically for large-|mean|
    # activations; fine here (conv bias folded out -> mean ~ 0), otherwise use a
    # two-pass / Welford reduction.
    var = jnp.maximum(csumsq / count - mean * mean, 0.0)              # biased var
    inv_std = jax.lax.rsqrt(var + eps)
    g32 = gamma.astype(jnp.float32)
    scale = (g32 * inv_std).reshape(Cout, 1)
    shift = (beta.astype(jnp.float32) - mean * g32 * inv_std).reshape(Cout, 1)

    # ---- Pallas kernel 2: conv recompute + BN affine + ReLU, lane-dense output ----
    y = pl.pallas_call(
        partial(conv_bn_relu_kernel, **statics),
        out_shape=jax.ShapeDtypeStruct((Npad, Cout, Lout), jnp.float32),
        grid_spec=pltpu.PrefetchScalarGridSpec(
            num_scalar_prefetch=0,
            grid=(Ng,),
            in_specs=[pl.BlockSpec((Nb, Cin, H, W), lambda g: (g, 0, 0, 0)),
                      pl.BlockSpec((Cout, K9), lambda g: (0, 0)),
                      pl.BlockSpec((Cout, 1), lambda g: (0, 0)),
                      pl.BlockSpec((Cout, 1), lambda g: (0, 0))],
            out_specs=pl.BlockSpec((Nb, Cout, Lout), lambda g: (g, 0, 0)),
            scratch_shapes=scratches),
        compiler_params=cparams,
    )(x, w9, scale, shift)

    # Already channel-major (NCHW order): drop lane tail, wrap columns, batch padding.
    out = y[:N, :, :L].reshape(N, Cout, H, Wp)[:, :, :, :W]
    return out


def _reference(x, w, b, gamma, beta, eps=1e-5):
    """Pure-JAX reference matching PyTorch ConvBlock.forward (training-mode BN)."""
    y = jax.lax.conv_general_dilated(
        x, w, window_strides=(1, 1), padding=((1, 1), (1, 1)),
        dimension_numbers=("NCHW", "OIHW", "NCHW"))
    y = y + b[None, :, None, None]
    mean = jnp.mean(y, axis=(0, 2, 3), keepdims=True)
    var = jnp.mean((y - mean) ** 2, axis=(0, 2, 3), keepdims=True)
    yhat = (y - mean) / jnp.sqrt(var + eps)
    return jnp.maximum(gamma[None, :, None, None] * yhat + beta[None, :, None, None], 0.0)


if __name__ == "__main__":
    key = jax.random.PRNGKey(0)
    k1, k2, k3 = jax.random.split(key, 3)

    N, Cin, H, W = 2, 4, 16, 16
    Cout, KH, KW = 8, 3, 3

    x = jax.random.normal(k1, (N, Cin, H, W), jnp.float32)
    # shapes follow nn.Conv2d / nn.BatchNorm2d from the module's __init__
    conv_w = jax.random.normal(k2, (Cout, Cin, KH, KW), jnp.float32) * 0.1
    conv_b = jax.random.normal(k3, (Cout,), jnp.float32) * 0.1
    bn_gamma = jnp.ones((Cout,), jnp.float32)    # PyTorch BN default init
    bn_beta = jnp.zeros((Cout,), jnp.float32)

    fwd = jax.jit(conv_block_forward)
    out = fwd(x, conv_w, conv_b, bn_gamma, bn_beta)
    out = jax.block_until_ready(out)

    ref = _reference(x, conv_w, conv_b, bn_gamma, bn_beta)
    assert out.shape == ref.shape, (out.shape, ref.shape)
    err = float(jnp.max(jnp.abs(out - ref)))
    # bf16 MXU inputs with f32 accumulation -> tolerance relaxed vs the all-f32 path.
    assert err < 3e-2, err

    print("KERNEL_OK")
</pallas_src>

<mosaic_0001>
module attributes {stable_mosaic.version = 11 : i64} {
  func.func @conv_bn_relu_kernel(%arg0: i32, %arg1: memref<1x4x16x16xf32, #tpu.memory_space<vmem>>, %arg2: memref<8x36xbf16, #tpu.memory_space<vmem>>, %arg3: memref<8x1xf32, #tpu.memory_space<vmem>>, %arg4: memref<8x1xf32, #tpu.memory_space<vmem>>, %arg5: memref<1x8x384xf32, #tpu.memory_space<vmem>>, %arg6: memref<1x4x512xf32, #tpu.memory_space<vmem>>, %arg7: memref<36x384xbf16, #tpu.memory_space<vmem>>) attributes {dimension_semantics = [#tpu.dimension_semantics<parallel>], iteration_bounds = array<i64: 2>, scalar_prefetch = 0 : i64, scratch_operands = 2 : i64, tpu.core_type = #tpu.core_type<tc>, window_params = [{transform_indices = @transform_0, window_bounds = array<i64: 1, 4, 16, 16>}, {pipeline_mode = #tpu.pipeline_mode<synchronous>, transform_indices = @transform_1, window_bounds = array<i64: 8, 36>}, {pipeline_mode = #tpu.pipeline_mode<synchronous>, transform_indices = @transform_2, window_bounds = array<i64: 8, 1>}, {pipeline_mode = #tpu.pipeline_mode<synchronous>, transform_indices = @transform_3, window_bounds = array<i64: 8, 1>}, {transform_indices = @transform_4, window_bounds = array<i64: 1, 8, 384>}]} {
    %cst = arith.constant 0.000000e+00 : f32
    %0 = vector.broadcast %cst : f32 to vector<1x4x512xf32>
    %c0 = arith.constant 0 : index
    %c0_0 = arith.constant 0 : index
    %c0_1 = arith.constant 0 : index
    %1 = vector.load %arg6[%c0, %c0_0, %c0_1] : memref<1x4x512xf32, #tpu.memory_space<vmem>>, vector<1x4x512xf32>
    tpu.vector_store %arg6[%c0, %c0_0, %c0_1], %0 {strides = array<i32>} : memref<1x4x512xf32, #tpu.memory_space<vmem>>, vector<1x4x512xf32>,
    %c0_2 = arith.constant 0 : index
    %c0_3 = arith.constant 0 : index
    %c0_4 = arith.constant 0 : index
    %c0_5 = arith.constant 0 : index
    %2 = vector.load %arg1[%c0_2, %c0_3, %c0_4, %c0_5] : memref<1x4x16x16xf32, #tpu.memory_space<vmem>>, vector<1x4x1x16xf32>
    %3 = vector.shape_cast %2 : vector<1x4x1x16xf32> to vector<4x16xf32>
    %c0_6 = arith.constant 0 : index
    %c0_7 = arith.constant 0 : index
    %c19 = arith.constant 19 : index
    %4 = vector.load %arg6[%c0_6, %c0_7, %c19] : memref<1x4x512xf32, #tpu.memory_space<vmem>>, vector<1x4x16xf32>
    %5 = vector.shape_cast %4 : vector<1x4x16xf32> to vector<4x16xf32>
    %6 = vector.shape_cast %3 : vector<4x16xf32> to vector<1x4x16xf32>
    tpu.vector_store %arg6[%c0_6, %c0_7, %c19], %6 {strides = array<i32>} : memref<1x4x512xf32, #tpu.memory_space<vmem>>, vector<1x4x16xf32>,
    %c0_8 = arith.constant 0 : index
    %c0_9 = arith.constant 0 : index
    %c1 = arith.constant 1 : index
    %c0_10 = arith.constant 0 : index
    %7 = vector.load %arg1[%c0_8, %c0_9, %c1, %c0_10] : memref<1x4x16x16xf32, #tpu.memory_space<vmem>>, vector<1x4x1x16xf32>
    %8 = vector.shape_cast %7 : vector<1x4x1x16xf32> to vector<4x16xf32>
    %c0_11 = arith.constant 0 : index
    %c0_12 = arith.constant 0 : index
    %c37 = arith.constant 37 : index
    %9 = vector.load %arg6[%c0_11, %c0_12, %c37] : memref<1x4x512xf32, #tpu.memory_space<vmem>>, vector<1x4x16xf32>
    %10 = vector.shape_cast %9 : vector<1x4x16xf32> to vector<4x16xf32>
    %11 = vector.shape_cast %8 : vector<4x16xf32> to vector<1x4x16xf32>
    tpu.vector_store %arg6[%c0_11, %c0_12, %c37], %11 {strides = array<i32>} : memref<1x4x512xf32, #tpu.memory_space<vmem>>, vector<1x4x16xf32>,
    %c0_13 = arith.constant 0 : index
    %c0_14 = arith.constant 0 : index
    %c2 = arith.constant 2 : index
    %c0_15 = arith.constant 0 : index
    %12 = vector.load %arg1[%c0_13, %c0_14, %c2, %c0_15] : memref<1x4x16x16xf32, #tpu.memory_space<vmem>>, vector<1x4x1x16xf32>
    %13 = vector.shape_cast %12 : vector<1x4x1x16xf32> to vector<4x16xf32>
    %c0_16 = arith.constant 0 : index
    %c0_17 = arith.constant 0 : index
    %c55 = arith.constant 55 : index
    %14 = vector.load %arg6[%c0_16, %c0_17, %c55] : memref<1x4x512xf32, #tpu.memory_space<vmem>>, vector<1x4x16xf32>
    %15 = vector.shape_cast %14 : vector<1x4x16xf32> to vector<4x16xf32>
    %16 = vector.shape_cast %13 : vector<4x16xf32> to vector<1x4x16xf32>
    tpu.vector_store %arg6[%c0_16, %c0_17, %c55], %16 {strides = array<i32>} : memref<1x4x512xf32, #tpu.memory_space<vmem>>, vector<1x4x16xf32>,
    %c0_18 = arith.constant 0 : index
    %c0_19 = arith.constant 0 : index
    %c3 = arith.constant 3 : index
    %c0_20 = arith.constant 0 : index
    %17 = vector.load %arg1[%c0_18, %c0_19, %c3, %c0_20] : memref<1x4x16x16xf32, #tpu.memory_space<vmem>>, vector<1x4x1x16xf32>
    %18 = vector.shape_cast %17 : vector<1x4x1x16xf32> to vector<4x16xf32>
    %c0_21 = arith.constant 0 : index
    %c0_22 = arith.constant 0 : index
    %c73 = arith.constant 73 : index
    %19 = vector.load %arg6[%c0_21, %c0_22, %c73] : memref<1x4x512xf32, #tpu.memory_space<vmem>>, vector<1x4x16xf32>
    %20 = vector.shape_cast %19 : vector<1x4x16xf32> to vector<4x16xf32>
    %21 = vector.shape_cast %18 : vector<4x16xf32> to vector<1x4x16xf32>
    tpu.vector_store %arg6[%c0_21, %c0_22, %c73], %21 {strides = array<i32>} : memref<1x4x512xf32, #tpu.memory_space<vmem>>, vector<1x4x16xf32>,
    %c0_23 = arith.constant 0 : index
    %c0_24 = arith.constant 0 : index
    %c4 = arith.constant 4 : index
    %c0_25 = arith.constant 0 : index
    %22 = vector.load %arg1[%c0_23, %c0_24, %c4, %c0_25] : memref<1x4x16x16xf32, #tpu.memory_space<vmem>>, vector<1x4x1x16xf32>
    %23 = vector.shape_cast %22 : vector<1x4x1x16xf32> to vector<4x16xf32>
    %c0_26 = arith.constant 0 : index
    %c0_27 = arith.constant 0 : index
    %c91 = arith.constant 91 : index
    %24 = vector.load %arg6[%c0_26, %c0_27, %c91] : memref<1x4x512xf32, #tpu.memory_space<vmem>>, vector<1x4x16xf32>
    %25 = vector.shape_cast %24 : vector<1x4x16xf32> to vector<4x16xf32>
    %26 = vector.shape_cast %23 : vector<4x16xf32> to vector<1x4x16xf32>
    tpu.vector_store %arg6[%c0_26, %c0_27, %c91], %26 {strides = array<i32>} : memref<1x4x512xf32, #tpu.memory_space<vmem>>, vector<1x4x16xf32>,
    %c0_28 = arith.constant 0 : index
    %c0_29 = arith.constant 0 : index
    %c5 = arith.constant 5 : index
    %c0_30 = arith.constant 0 : index
    %27 = vector.load %arg1[%c0_28, %c0_29, %c5, %c0_30] : memref<1x4x16x16xf32, #tpu.memory_space<vmem>>, vector<1x4x1x16xf32>
    %28 = vector.shape_cast %27 : vector<1x4x1x16xf32> to vector<4x16xf32>
    %c0_31 = arith.constant 0 : index
    %c0_32 = arith.constant 0 : index
    %c109 = arith.constant 109 : index
    %29 = vector.load %arg6[%c0_31, %c0_32, %c109] : memref<1x4x512xf32, #tpu.memory_space<vmem>>, vector<1x4x16xf32>
    %30 = vector.shape_cast %29 : vector<1x4x16xf32> to vector<4x16xf32>
    %31 = vector.shape_cast %28 : vector<4x16xf32> to vector<1x4x16xf32>
    tpu.vector_store %arg6[%c0_31, %c0_32, %c109], %31 {strides = array<i32>} : memref<1x4x512xf32, #tpu.memory_space<vmem>>, vector<1x4x16xf32>,
    %c0_33 = arith.constant 0 : index
    %c0_34 = arith.constant 0 : index
    %c6 = arith.constant 6 : index
    %c0_35 = arith.constant 0 : index
    %32 = vector.load %arg1[%c0_33, %c0_34, %c6, %c0_35] : memref<1x4x16x16xf32, #tpu.memory_space<vmem>>, vector<1x4x1x16xf32>
    %33 = vector.shape_cast %32 : vector<1x4x1x16xf32> to vector<4x16xf32>
    %c0_36 = arith.constant 0 : index
    %c0_37 = arith.constant 0 : index
    %c127 = arith.constant 127 : index
    %34 = vector.load %arg6[%c0_36, %c0_37, %c127] : memref<1x4x512xf32, #tpu.memory_space<vmem>>, vector<1x4x16xf32>
    %35 = vector.shape_cast %34 : vector<1x4x16xf32> to vector<4x16xf32>
    %36 = vector.shape_cast %33 : vector<4x16xf32> to vector<1x4x16xf32>
    tpu.vector_store %arg6[%c0_36, %c0_37, %c127], %36 {strides = array<i32>} : memref<1x4x512xf32, #tpu.memory_space<vmem>>, vector<1x4x16xf32>,
    %c0_38 = arith.constant 0 : index
    %c0_39 = arith.constant 0 : index
    %c7 = arith.constant 7 : index
    %c0_40 = arith.constant 0 : index
    %37 = vector.load %arg1[%c0_38, %c0_39, %c7, %c0_40] : memref<1x4x16x16xf32, #tpu.memory_space<vmem>>, vector<1x4x1x16xf32>
    %38 = vector.shape_cast %37 : vector<1x4x1x16xf32> to vector<4x16xf32>
    %c0_41 = arith.constant 0 : index
    %c0_42 = arith.constant 0 : index
    %c145 = arith.constant 145 : index
    %39 = vector.load %arg6[%c0_41, %c0_42, %c145] : memref<1x4x512xf32, #tpu.memory_space<vmem>>, vector<1x4x16xf32>
    %40 = vector.shape_cast %39 : vector<1x4x16xf32> to vector<4x16xf32>
    %41 = vector.shape_cast %38 : vector<4x16xf32> to vector<1x4x16xf32>
    tpu.vector_store %arg6[%c0_41, %c0_42, %c145], %41 {strides = array<i32>} : memref<1x4x512xf32, #tpu.memory_space<vmem>>, vector<1x4x16xf32>,
    %c0_43 = arith.constant 0 : index
    %c0_44 = arith.constant 0 : index
    %c8 = arith.constant 8 : index
    %c0_45 = arith.constant 0 : index
    %42 = vector.load %arg1[%c0_43, %c0_44, %c8, %c0_45] : memref<1x4x16x16xf32, #tpu.memory_space<vmem>>, vector<1x4x1x16xf32>
    %43 = vector.shape_cast %42 : vector<1x4x1x16xf32> to vector<4x16xf32>
    %c0_46 = arith.constant 0 : index
    %c0_47 = arith.constant 0 : index
    %c163 = arith.constant 163 : index
    %44 = vector.load %arg6[%c0_46, %c0_47, %c163] : memref<1x4x512xf32, #tpu.memory_space<vmem>>, vector<1x4x16xf32>
    %45 = vector.shape_cast %44 : vector<1x4x16xf32> to vector<4x16xf32>
    %46 = vector.shape_cast %43 : vector<4x16xf32> to vector<1x4x16xf32>
    tpu.vector_store %arg6[%c0_46, %c0_47, %c163], %46 {strides = array<i32>} : memref<1x4x512xf32, #tpu.memory_space<vmem>>, vector<1x4x16xf32>,
    %c0_48 = arith.constant 0 : index
    %c0_49 = arith.constant 0 : index
    %c9 = arith.constant 9 : index
    %c0_50 = arith.constant 0 : index
    %47 = vector.load %arg1[%c0_48, %c0_49, %c9, %c0_50] : memref<1x4x16x16xf32, #tpu.memory_space<vmem>>, vector<1x4x1x16xf32>
    %48 = vector.shape_cast %47 : vector<1x4x1x16xf32> to vector<4x16xf32>
    %c0_51 = arith.constant 0 : index
    %c0_52 = arith.constant 0 : index
    %c181 = arith.constant 181 : index
    %49 = vector.load %arg6[%c0_51, %c0_52, %c181] : memref<1x4x512xf32, #tpu.memory_space<vmem>>, vector<1x4x16xf32>
    %50 = vector.shape_cast %49 : vector<1x4x16xf32> to vector<4x16xf32>
    %51 = vector.shape_cast %48 : vector<4x16xf32> to vector<1x4x16xf32>
    tpu.vector_store %arg6[%c0_51, %c0_52, %c181], %51 {strides = array<i32>} : memref<1x4x512xf32, #tpu.memory_space<vmem>>, vector<1x4x16xf32>,
    %c0_53 = arith.constant 0 : index
    %c0_54 = arith.constant 0 : index
    %c10 = arith.constant 10 : index
    %c0_55 = arith.constant 0 : index
    %52 = vector.load %arg1[%c0_53, %c0_54, %c10, %c0_55] : memref<1x4x16x16xf32, #tpu.memory_space<vmem>>, vector<1x4x1x16xf32>
    %53 = vector.shape_cast %52 : vector<1x4x1x16xf32> to vector<4x16xf32>
    %c0_56 = arith.constant 0 : index
    %c0_57 = arith.constant 0 : index
    %c199 = arith.constant 199 : index
    %54 = vector.load %arg6[%c0_56, %c0_57, %c199] : memref<1x4x512xf32, #tpu.memory_space<vmem>>, vector<1x4x16xf32>
    %55 = vector.shape_cast %54 : vector<1x4x16xf32> to vector<4x16xf32>
    %56 = vector.shape_cast %53 : vector<4x16xf32> to vector<1x4x16xf32>
    tpu.vector_store %arg6[%c0_56, %c0_57, %c199], %56 {strides = array<i32>} : memref<1x4x512xf32, #tpu.memory_space<vmem>>, vector<1x4x16xf32>,
    %c0_58 = arith.constant 0 : index
    %c0_59 = arith.constant 0 : index
    %c11 = arith.constant 11 : index
    %c0_60 = arith.constant 0 : index
    %57 = vector.load %arg1[%c0_58, %c0_59, %c11, %c0_60] : memref<1x4x16x16xf32, #tpu.memory_space<vmem>>, vector<1x4x1x16xf32>
    %58 = vector.shape_cast %57 : vector<1x4x1x16xf32> to vector<4x16xf32>
    %c0_61 = arith.constant 0 : index
    %c0_62 = arith.constant 0 : index
    %c217 = arith.constant 217 : index
    %59 = vector.load %arg6[%c0_61, %c0_62, %c217] : memref<1x4x512xf32, #tpu.memory_space<vmem>>, vector<1x4x16xf32>
    %60 = vector.shape_cast %59 : vector<1x4x16xf32> to vector<4x16xf32>
    %61 = vector.shape_cast %58 : vector<4x16xf32> to vector<1x4x16xf32>
    tpu.vector_store %arg6[%c0_61, %c0_62, %c217], %61 {strides = array<i32>} : memref<1x4x512xf32, #tpu.memory_space<vmem>>, vector<1x4x16xf32>,
    %c0_63 = arith.constant 0 : index
    %c0_64 = arith.constant 0 : index
    %c12 = arith.constant 12 : index
    %c0_65 = arith.constant 0 : index
    %62 = vector.load %arg1[%c0_63, %c0_64, %c12, %c0_65] : memref<1x4x16x16xf32, #tpu.memory_space<vmem>>, vector<1x4x1x16xf32>
    %63 = vector.shape_cast %62 : vector<1x4x1x16xf32> to vector<4x16xf32>
    %c0_66 = arith.constant 0 : index
    %c0_67 = arith.constant 0 : index
    %c235 = arith.constant 235 : index
    %64 = vector.load %arg6[%c0_66, %c0_67, %c235] : memref<1x4x512xf32, #tpu.memory_space<vmem>>, vector<1x4x16xf32>
    %65 = vector.shape_cast %64 : vector<1x4x16xf32> to vector<4x16xf32>
    %66 = vector.shape_cast %63 : vector<4x16xf32> to vector<1x4x16xf32>
    tpu.vector_store %arg6[%c0_66, %c0_67, %c235], %66 {strides = array<i32>} : memref<1x4x512xf32, #tpu.memory_space<vmem>>, vector<1x4x16xf32>,
    %c0_68 = arith.constant 0 : index
    %c0_69 = arith.constant 0 : index
    %c13 = arith.constant 13 : index
    %c0_70 = arith.constant 0 : index
    %67 = vector.load %arg1[%c0_68, %c0_69, %c13, %c0_70] : memref<1x4x16x16xf32, #tpu.memory_space<vmem>>, vector<1x4x1x16xf32>
    %68 = vector.shape_cast %67 : vector<1x4x1x16xf32> to vector<4x16xf32>
    %c0_71 = arith.constant 0 : index
    %c0_72 = arith.constant 0 : index
    %c253 = arith.constant 253 : index
    %69 = vector.load %arg6[%c0_71, %c0_72, %c253] : memref<1x4x512xf32, #tpu.memory_space<vmem>>, vector<1x4x16xf32>
    %70 = vector.shape_cast %69 : vector<1x4x16xf32> to vector<4x16xf32>
    %71 = vector.shape_cast %68 : vector<4x16xf32> to vector<1x4x16xf32>
    tpu.vector_store %arg6[%c0_71, %c0_72, %c253], %71 {strides = array<i32>} : memref<1x4x512xf32, #tpu.memory_space<vmem>>, vector<1x4x16xf32>,
    %c0_73 = arith.constant 0 : index
    %c0_74 = arith.constant 0 : index
    %c14 = arith.constant 14 : index
    %c0_75 = arith.constant 0 : index
    %72 = vector.load %arg1[%c0_73, %c0_74, %c14, %c0_75] : memref<1x4x16x16xf32, #tpu.memory_space<vmem>>, vector<1x4x1x16xf32>
    %73 = vector.shape_cast %72 : vector<1x4x1x16xf32> to vector<4x16xf32>
    %c0_76 = arith.constant 0 : index
    %c0_77 = arith.constant 0 : index
    %c271 = arith.constant 271 : index
    %74 = vector.load %arg6[%c0_76, %c0_77, %c271] : memref<1x4x512xf32, #tpu.memory_space<vmem>>, vector<1x4x16xf32>
    %75 = vector.shape_cast %74 : vector<1x4x16xf32> to vector<4x16xf32>
    %76 = vector.shape_cast %73 : vector<4x16xf32> to vector<1x4x16xf32>
    tpu.vector_store %arg6[%c0_76, %c0_77, %c271], %76 {strides = array<i32>} : memref<1x4x512xf32, #tpu.memory_space<vmem>>, vector<1x4x16xf32>,
    %c0_78 = arith.constant 0 : index
    %c0_79 = arith.constant 0 : index
    %c15 = arith.constant 15 : index
    %c0_80 = arith.constant 0 : index
    %77 = vector.load %arg1[%c0_78, %c0_79, %c15, %c0_80] : memref<1x4x16x16xf32, #tpu.memory_space<vmem>>, vector<1x4x1x16xf32>
    %78 = vector.shape_cast %77 : vector<1x4x1x16xf32> to vector<4x16xf32>
    %c0_81 = arith.constant 0 : index
    %c0_82 = arith.constant 0 : index
    %c289 = arith.constant 289 : index
    %79 = vector.load %arg6[%c0_81, %c0_82, %c289] : memref<1x4x512xf32, #tpu.memory_space<vmem>>, vector<1x4x16xf32>
    %80 = vector.shape_cast %79 : vector<1x4x16xf32> to vector<4x16xf32>
    %81 = vector.shape_cast %78 : vector<4x16xf32> to vector<1x4x16xf32>
    tpu.vector_store %arg6[%c0_81, %c0_82, %c289], %81 {strides = array<i32>} : memref<1x4x512xf32, #tpu.memory_space<vmem>>, vector<1x4x16xf32>,
    %c0_83 = arith.constant 0 : index
    %c0_84 = arith.constant 0 : index
    %c0_85 = arith.constant 0 : index
    %82 = vector.load %arg6[%c0_83, %c0_84, %c0_85] : memref<1x4x512xf32, #tpu.memory_space<vmem>>, vector<1x4x384xf32>
    %83 = vector.shape_cast %82 : vector<1x4x384xf32> to vector<4x384xf32>
    %84 = arith.truncf %83 : vector<4x384xf32> to vector<4x384xbf16>
    %c0_86 = arith.constant 0 : index
    %c0_87 = arith.constant 0 : index
    %85 = vector.load %arg7[%c0_86, %c0_87] : memref<36x384xbf16, #tpu.memory_space<vmem>>, vector<4x384xbf16>
    tpu.vector_store %arg7[%c0_86, %c0_87], %84 {strides = array<i32>} : memref<36x384xbf16, #tpu.memory_space<vmem>>, vector<4x384xbf16>,
    %c0_88 = arith.constant 0 : index
    %c0_89 = arith.constant 0 : index
    %c1_90 = arith.constant 1 : index
    %86 = vector.load %arg6[%c0_88, %c0_89, %c1_90] : memref<1x4x512xf32, #tpu.memory_space<vmem>>, vector<1x4x384xf32>
    %87 = vector.shape_cast %86 : vector<1x4x384xf32> to vector<4x384xf32>
    %88 = arith.truncf %87 : vector<4x384xf32> to vector<4x384xbf16>
    %c4_91 = arith.constant 4 : index
    %c0_92 = arith.constant 0 : index
    %89 = vector.load %arg7[%c4_91, %c0_92] : memref<36x384xbf16, #tpu.memory_space<vmem>>, vector<4x384xbf16>
    tpu.vector_store %arg7[%c4_91, %c0_92], %88 {strides = array<i32>} : memref<36x384xbf16, #tpu.memory_space<vmem>>, vector<4x384xbf16>,
    %c0_93 = arith.constant 0 : index
    %c0_94 = arith.constant 0 : index
    %c2_95 = arith.constant 2 : index
    %90 = vector.load %arg6[%c0_93, %c0_94, %c2_95] : memref<1x4x512xf32, #tpu.memory_space<vmem>>, vector<1x4x384xf32>
    %91 = vector.shape_cast %90 : vector<1x4x384xf32> to vector<4x384xf32>
    %92 = arith.truncf %91 : vector<4x384xf32> to vector<4x384xbf16>
    %c8_96 = arith.constant 8 : index
    %c0_97 = arith.constant 0 : index
    %93 = vector.load %arg7[%c8_96, %c0_97] : memref<36x384xbf16, #tpu.memory_space<vmem>>, vector<4x384xbf16>
    tpu.vector_store %arg7[%c8_96, %c0_97], %92 {strides = array<i32>} : memref<36x384xbf16, #tpu.memory_space<vmem>>, vector<4x384xbf16>,
    %c0_98 = arith.constant 0 : index
    %c0_99 = arith.constant 0 : index
    %c18 = arith.constant 18 : index
    %94 = vector.load %arg6[%c0_98, %c0_99, %c18] : memref<1x4x512xf32, #tpu.memory_space<vmem>>, vector<1x4x384xf32>
    %95 = vector.shape_cast %94 : vector<1x4x384xf32> to vector<4x384xf32>
    %96 = arith.truncf %95 : vector<4x384xf32> to vector<4x384xbf16>
    %c12_100 = arith.constant 12 : index
    %c0_101 = arith.constant 0 : index
    %97 = vector.load %arg7[%c12_100, %c0_101] : memref<36x384xbf16, #tpu.memory_space<vmem>>, vector<4x384xbf16>
    tpu.vector_store %arg7[%c12_100, %c0_101], %96 {strides = array<i32>} : memref<36x384xbf16, #tpu.memory_space<vmem>>, vector<4x384xbf16>,
    %c0_102 = arith.constant 0 : index
    %c0_103 = arith.constant 0 : index
    %c19_104 = arith.constant 19 : index
    %98 = vector.load %arg6[%c0_102, %c0_103, %c19_104] : memref<1x4x512xf32, #tpu.memory_space<vmem>>, vector<1x4x384xf32>
    %99 = vector.shape_cast %98 : vector<1x4x384xf32> to vector<4x384xf32>
    %100 = arith.truncf %99 : vector<4x384xf32> to vector<4x384xbf16>
    %c16 = arith.constant 16 : index
    %c0_105 = arith.constant 0 : index
    %101 = vector.load %arg7[%c16, %c0_105] : memref<36x384xbf16, #tpu.memory_space<vmem>>, vector<4x384xbf16>
    tpu.vector_store %arg7[%c16, %c0_105], %100 {strides = array<i32>} : memref<36x384xbf16, #tpu.memory_space<vmem>>, vector<4x384xbf16>,
    %c0_106 = arith.constant 0 : index
    %c0_107 = arith.constant 0 : index
    %c20 = arith.constant 20 : index
    %102 = vector.load %arg6[%c0_106, %c0_107, %c20] : memref<1x4x512xf32, #tpu.memory_space<vmem>>, vector<1x4x384xf32>
    %103 = vector.shape_cast %102 : vector<1x4x384xf32> to vector<4x384xf32>
    %104 = arith.truncf %103 : vector<4x384xf32> to vector<4x384xbf16>
    %c20_108 = arith.constant 20 : index
    %c0_109 = arith.constant 0 : index
    %105 = vector.load %arg7[%c20_108, %c0_109] : memref<36x384xbf16, #tpu.memory_space<vmem>>, vector<4x384xbf16>
    tpu.vector_store %arg7[%c20_108, %c0_109], %104 {strides = array<i32>} : memref<36x384xbf16, #tpu.memory_space<vmem>>, vector<4x384xbf16>,
    %c0_110 = arith.constant 0 : index
    %c0_111 = arith.constant 0 : index
    %c36 = arith.constant 36 : index
    %106 = vector.load %arg6[%c0_110, %c0_111, %c36] : memref<1x4x512xf32, #tpu.memory_space<vmem>>, vector<1x4x384xf32>
    %107 = vector.shape_cast %106 : vector<1x4x384xf32> to vector<4x384xf32>
    %108 = arith.truncf %107 : vector<4x384xf32> to vector<4x384xbf16>
    %c24 = arith.constant 24 : index
    %c0_112 = arith.constant 0 : index
    %109 = vector.load %arg7[%c24, %c0_112] : memref<36x384xbf16, #tpu.memory_space<vmem>>, vector<4x384xbf16>
    tpu.vector_store %arg7[%c24, %c0_112], %108 {strides = array<i32>} : memref<36x384xbf16, #tpu.memory_space<vmem>>, vector<4x384xbf16>,
    %c0_113 = arith.constant 0 : index
    %c0_114 = arith.constant 0 : index
    %c37_115 = arith.constant 37 : index
    %110 = vector.load %arg6[%c0_113, %c0_114, %c37_115] : memref<1x4x512xf32, #tpu.memory_space<vmem>>, vector<1x4x384xf32>
    %111 = vector.shape_cast %110 : vector<1x4x384xf32> to vector<4x384xf32>
    %112 = arith.truncf %111 : vector<4x384xf32> to vector<4x384xbf16>
    %c28 = arith.constant 28 : index
    %c0_116 = arith.constant 0 : index
    %113 = vector.load %arg7[%c28, %c0_116] : memref<36x384xbf16, #tpu.memory_space<vmem>>, vector<4x384xbf16>
    tpu.vector_store %arg7[%c28, %c0_116], %112 {strides = array<i32>} : memref<36x384xbf16, #tpu.memory_space<vmem>>, vector<4x384xbf16>,
    %c0_117 = arith.constant 0 : index
    %c0_118 = arith.constant 0 : index
    %c38 = arith.constant 38 : index
    %114 = vector.load %arg6[%c0_117, %c0_118, %c38] : memref<1x4x512xf32, #tpu.memory_space<vmem>>, vector<1x4x384xf32>
    %115 = vector.shape_cast %114 : vector<1x4x384xf32> to vector<4x384xf32>
    %116 = arith.truncf %115 : vector<4x384xf32> to vector<4x384xbf16>
    %c32 = arith.constant 32 : index
    %c0_119 = arith.constant 0 : index
    %117 = vector.load %arg7[%c32, %c0_119] : memref<36x384xbf16, #tpu.memory_space<vmem>>, vector<4x384xbf16>
    tpu.vector_store %arg7[%c32, %c0_119], %116 {strides = array<i32>} : memref<36x384xbf16, #tpu.memory_space<vmem>>, vector<4x384xbf16>,
    %c0_120 = arith.constant 0 : index
    %c0_121 = arith.constant 0 : index
    %118 = vector.load %arg2[%c0_120, %c0_121] : memref<8x36xbf16, #tpu.memory_space<vmem>>, vector<8x36xbf16>
    %c0_122 = arith.constant 0 : index
    %c0_123 = arith.constant 0 : index
    %119 = vector.load %arg7[%c0_122, %c0_123] : memref<36x384xbf16, #tpu.memory_space<vmem>>, vector<36x384xbf16>
    %cst_124 = arith.constant dense<0.000000e+00> : vector<8x384xf32>
    %120 = tpu.matmul %118, %119, %cst_124 {dimension_numbers = #tpu.dot_dimension_numbers<[1], [0], [0], [1], [0, 0, 1, 1], [], []>} : vector<8x36xbf16>, vector<36x384xbf16>, vector<8x384xf32> -> vector<8x384xf32>
    %c0_125 = arith.constant 0 : index
    %c0_126 = arith.constant 0 : index
    %121 = vector.load %arg3[%c0_125, %c0_126] : memref<8x1xf32, #tpu.memory_space<vmem>>, vector<8x1xf32>
    %122 = vector.broadcast %121 : vector<8x1xf32> to vector<8x384xf32>
    %123 = arith.mulf %120, %122 : vector<8x384xf32>
    %c0_127 = arith.constant 0 : index
    %c0_128 = arith.constant 0 : index
    %124 = vector.load %arg4[%c0_127, %c0_128] : memref<8x1xf32, #tpu.memory_space<vmem>>, vector<8x1xf32>
    %125 = vector.broadcast %124 : vector<8x1xf32> to vector<8x384xf32>
    %126 = arith.addf %123, %125 : vector<8x384xf32>
    %cst_129 = arith.constant 0.000000e+00 : f32
    %127 = vector.broadcast %cst_129 : f32 to vector<8x384xf32>
    %128 = arith.maximumf %126, %127 : vector<8x384xf32>
    %c0_130 = arith.constant 0 : index
    %c0_131 = arith.constant 0 : index
    %c0_132 = arith.constant 0 : index
    %129 = vector.load %arg5[%c0_130, %c0_131, %c0_132] : memref<1x8x384xf32, #tpu.memory_space<vmem>>, vector<1x8x384xf32>
    %130 = vector.shape_cast %129 : vector<1x8x384xf32> to vector<8x384xf32>
    %131 = vector.shape_cast %128 : vector<8x384xf32> to vector<1x8x384xf32>
    tpu.vector_store %arg5[%c0_130, %c0_131, %c0_132], %131 {strides = array<i32>} : memref<1x8x384xf32, #tpu.memory_space<vmem>>, vector<1x8x384xf32>,
    return
  }
  func.func @transform_0(%arg0: i32) -> (i32, i32, i32, i32) {
    %c0_i32 = arith.constant 0 : i32
    %c0_i32_0 = arith.constant 0 : i32
    %c0_i32_1 = arith.constant 0 : i32
    %c0_i32_2 = arith.constant 0 : i32
    return %arg0, %c0_i32, %c0_i32_0, %c0_i32_1 : i32, i32, i32, i32
  }
  func.func @transform_1(%arg0: i32) -> (i32, i32) {
    %c0_i32 = arith.constant 0 : i32
    %c0_i32_0 = arith.constant 0 : i32
    %c0_i32_1 = arith.constant 0 : i32
    return %c0_i32, %c0_i32_0 : i32, i32
  }
  func.func @transform_2(%arg0: i32) -> (i32, i32) {
    %c0_i32 = arith.constant 0 : i32
    %c0_i32_0 = arith.constant 0 : i32
    %c0_i32_1 = arith.constant 0 : i32
    return %c0_i32, %c0_i32_0 : i32, i32
  }
  func.func @transform_3(%arg0: i32) -> (i32, i32) {
    %c0_i32 = arith.constant 0 : i32
    %c0_i32_0 = arith.constant 0 : i32
    %c0_i32_1 = arith.constant 0 : i32
    return %c0_i32, %c0_i32_0 : i32, i32
  }
  func.func @transform_4(%arg0: i32) -> (i32, i32, i32) {
    %c0_i32 = arith.constant 0 : i32
    %c0_i32_0 = arith.constant 0 : i32
    %c0_i32_1 = arith.constant 0 : i32
    return %arg0, %c0_i32, %c0_i32_0 : i32, i32, i32
  }
}

module attributes {stable_mosaic.version = 11 : i64} {
  func.func @conv_stats_kernel(%arg0: i32, %arg1: memref<1x4x16x16xf32, #tpu.memory_space<vmem>>, %arg2: memref<8x36xbf16, #tpu.memory_space<vmem>>, %arg3: memref<1x384xf32, #tpu.memory_space<vmem>>, %arg4: memref<1x8x2xf32, #tpu.memory_space<vmem>>, %arg5: memref<1x4x512xf32, #tpu.memory_space<vmem>>, %arg6: memref<36x384xbf16, #tpu.memory_space<vmem>>) attributes {dimension_semantics = [#tpu.dimension_semantics<parallel>], iteration_bounds = array<i64: 2>, scalar_prefetch = 0 : i64, scratch_operands = 2 : i64, tpu.core_type = #tpu.core_type<tc>, window_params = [{transform_indices = @transform_0, window_bounds = array<i64: 1, 4, 16, 16>}, {pipeline_mode = #tpu.pipeline_mode<synchronous>, transform_indices = @transform_1, window_bounds = array<i64: 8, 36>}, {pipeline_mode = #tpu.pipeline_mode<synchronous>, transform_indices = @transform_2, window_bounds = array<i64: 1, 384>}, {transform_indices = @transform_3, window_bounds = array<i64: 1, 8, 2>}]} {
    %cst = arith.constant 0.000000e+00 : f32
    %0 = vector.broadcast %cst : f32 to vector<1x4x512xf32>
    %c0 = arith.constant 0 : index
    %c0_0 = arith.constant 0 : index
    %c0_1 = arith.constant 0 : index
    %1 = vector.load %arg5[%c0, %c0_0, %c0_1] : memref<1x4x512xf32, #tpu.memory_space<vmem>>, vector<1x4x512xf32>
    tpu.vector_store %arg5[%c0, %c0_0, %c0_1], %0 {strides = array<i32>} : memref<1x4x512xf32, #tpu.memory_space<vmem>>, vector<1x4x512xf32>,
    %c0_2 = arith.constant 0 : index
    %c0_3 = arith.constant 0 : index
    %c0_4 = arith.constant 0 : index
    %c0_5 = arith.constant 0 : index
    %2 = vector.load %arg1[%c0_2, %c0_3, %c0_4, %c0_5] : memref<1x4x16x16xf32, #tpu.memory_space<vmem>>, vector<1x4x1x16xf32>
    %3 = vector.shape_cast %2 : vector<1x4x1x16xf32> to vector<4x16xf32>
    %c0_6 = arith.constant 0 : index
    %c0_7 = arith.constant 0 : index
    %c19 = arith.constant 19 : index
    %4 = vector.load %arg5[%c0_6, %c0_7, %c19] : memref<1x4x512xf32, #tpu.memory_space<vmem>>, vector<1x4x16xf32>
    %5 = vector.shape_cast %4 : vector<1x4x16xf32> to vector<4x16xf32>
    %6 = vector.shape_cast %3 : vector<4x16xf32> to vector<1x4x16xf32>
    tpu.vector_store %arg5[%c0_6, %c0_7, %c19], %6 {strides = array<i32>} : memref<1x4x512xf32, #tpu.memory_space<vmem>>, vector<1x4x16xf32>,
    %c0_8 = arith.constant 0 : index
    %c0_9 = arith.constant 0 : index
    %c1 = arith.constant 1 : index
    %c0_10 = arith.constant 0 : index
    %7 = vector.load %arg1[%c0_8, %c0_9, %c1, %c0_10] : memref<1x4x16x16xf32, #tpu.memory_space<vmem>>, vector<1x4x1x16xf32>
    %8 = vector.shape_cast %7 : vector<1x4x1x16xf32> to vector<4x16xf32>
    %c0_11 = arith.constant 0 : index
    %c0_12 = arith.constant 0 : index
    %c37 = arith.constant 37 : index
    %9 = vector.load %arg5[%c0_11, %c0_12, %c37] : memref<1x4x512xf32, #tpu.memory_space<vmem>>, vector<1x4x16xf32>
    %10 = vector.shape_cast %9 : vector<1x4x16xf32> to vector<4x16xf32>
    %11 = vector.shape_cast %8 : vector<4x16xf32> to vector<1x4x16xf32>
    tpu.vector_store %arg5[%c0_11, %c0_12, %c37], %11 {strides = array<i32>} : memref<1x4x512xf32, #tpu.memory_space<vmem>>, vector<1x4x16xf32>,
    %c0_13 = arith.constant 0 : index
    %c0_14 = arith.constant 0 : index
    %c2 = arith.constant 2 : index
    %c0_15 = arith.constant 0 : index
    %12 = vector.load %arg1[%c0_13, %c0_14, %c2, %c0_15] : memref<1x4x16x16xf32, #tpu.memory_space<vmem>>, vector<1x4x1x16xf32>
    %13 = vector.shape_cast %12 : vector<1x4x1x16xf32> to vector<4x16xf32>
    %c0_16 = arith.constant 0 : index
    %c0_17 = arith.constant 0 : index
    %c55 = arith.constant 55 : index
    %14 = vector.load %arg5[%c0_16, %c0_17, %c55] : memref<1x4x512xf32, #tpu.memory_space<vmem>>, vector<1x4x16xf32>
    %15 = vector.shape_cast %14 : vector<1x4x16xf32> to vector<4x16xf32>
    %16 = vector.shape_cast %13 : vector<4x16xf32> to vector<1x4x16xf32>
    tpu.vector_store %arg5[%c0_16, %c0_17, %c55], %16 {strides = array<i32>} : memref<1x4x512xf32, #tpu.memory_space<vmem>>, vector<1x4x16xf32>,
    %c0_18 = arith.constant 0 : index
    %c0_19 = arith.constant 0 : index
    %c3 = arith.constant 3 : index
    %c0_20 = arith.constant 0 : index
    %17 = vector.load %arg1[%c0_18, %c0_19, %c3, %c0_20] : memref<1x4x16x16xf32, #tpu.memory_space<vmem>>, vector<1x4x1x16xf32>
    %18 = vector.shape_cast %17 : vector<1x4x1x16xf32> to vector<4x16xf32>
    %c0_21 = arith.constant 0 : index
    %c0_22 = arith.constant 0 : index
    %c73 = arith.constant 73 : index
    %19 = vector.load %arg5[%c0_21, %c0_22, %c73] : memref<1x4x512xf32, #tpu.memory_space<vmem>>, vector<1x4x16xf32>
    %20 = vector.shape_cast %19 : vector<1x4x16xf32> to vector<4x16xf32>
    %21 = vector.shape_cast %18 : vector<4x16xf32> to vector<1x4x16xf32>
    tpu.vector_store %arg5[%c0_21, %c0_22, %c73], %21 {strides = array<i32>} : memref<1x4x512xf32, #tpu.memory_space<vmem>>, vector<1x4x16xf32>,
    %c0_23 = arith.constant 0 : index
    %c0_24 = arith.constant 0 : index
    %c4 = arith.constant 4 : index
    %c0_25 = arith.constant 0 : index
    %22 = vector.load %arg1[%c0_23, %c0_24, %c4, %c0_25] : memref<1x4x16x16xf32, #tpu.memory_space<vmem>>, vector<1x4x1x16xf32>
    %23 = vector.shape_cast %22 : vector<1x4x1x16xf32> to vector<4x16xf32>
    %c0_26 = arith.constant 0 : index
    %c0_27 = arith.constant 0 : index
    %c91 = arith.constant 91 : index
    %24 = vector.load %arg5[%c0_26, %c0_27, %c91] : memref<1x4x512xf32, #tpu.memory_space<vmem>>, vector<1x4x16xf32>
    %25 = vector.shape_cast %24 : vector<1x4x16xf32> to vector<4x16xf32>
    %26 = vector.shape_cast %23 : vector<4x16xf32> to vector<1x4x16xf32>
    tpu.vector_store %arg5[%c0_26, %c0_27, %c91], %26 {strides = array<i32>} : memref<1x4x512xf32, #tpu.memory_space<vmem>>, vector<1x4x16xf32>,
    %c0_28 = arith.constant 0 : index
    %c0_29 = arith.constant 0 : index
    %c5 = arith.constant 5 : index
    %c0_30 = arith.constant 0 : index
    %27 = vector.load %arg1[%c0_28, %c0_29, %c5, %c0_30] : memref<1x4x16x16xf32, #tpu.memory_space<vmem>>, vector<1x4x1x16xf32>
    %28 = vector.shape_cast %27 : vector<1x4x1x16xf32> to vector<4x16xf32>
    %c0_31 = arith.constant 0 : index
    %c0_32 = arith.constant 0 : index
    %c109 = arith.constant 109 : index
    %29 = vector.load %arg5[%c0_31, %c0_32, %c109] : memref<1x4x512xf32, #tpu.memory_space<vmem>>, vector<1x4x16xf32>
    %30 = vector.shape_cast %29 : vector<1x4x16xf32> to vector<4x16xf32>
    %31 = vector.shape_cast %28 : vector<4x16xf32> to vector<1x4x16xf32>
    tpu.vector_store %arg5[%c0_31, %c0_32, %c109], %31 {strides = array<i32>} : memref<1x4x512xf32, #tpu.memory_space<vmem>>, vector<1x4x16xf32>,
    %c0_33 = arith.constant 0 : index
    %c0_34 = arith.constant 0 : index
    %c6 = arith.constant 6 : index
    %c0_35 = arith.constant 0 : index
    %32 = vector.load %arg1[%c0_33, %c0_34, %c6, %c0_35] : memref<1x4x16x16xf32, #tpu.memory_space<vmem>>, vector<1x4x1x16xf32>
    %33 = vector.shape_cast %32 : vector<1x4x1x16xf32> to vector<4x16xf32>
    %c0_36 = arith.constant 0 : index
    %c0_37 = arith.constant 0 : index
    %c127 = arith.constant 127 : index
    %34 = vector.load %arg5[%c0_36, %c0_37, %c127] : memref<1x4x512xf32, #tpu.memory_space<vmem>>, vector<1x4x16xf32>
    %35 = vector.shape_cast %34 : vector<1x4x16xf32> to vector<4x16xf32>
    %36 = vector.shape_cast %33 : vector<4x16xf32> to vector<1x4x16xf32>
    tpu.vector_store %arg5[%c0_36, %c0_37, %c127], %36 {strides = array<i32>} : memref<1x4x512xf32, #tpu.memory_space<vmem>>, vector<1x4x16xf32>,
    %c0_38 = arith.constant 0 : index
    %c0_39 = arith.constant 0 : index
    %c7 = arith.constant 7 : index
    %c0_40 = arith.constant 0 : index
    %37 = vector.load %arg1[%c0_38, %c0_39, %c7, %c0_40] : memref<1x4x16x16xf32, #tpu.memory_space<vmem>>, vector<1x4x1x16xf32>
    %38 = vector.shape_cast %37 : vector<1x4x1x16xf32> to vector<4x16xf32>
    %c0_41 = arith.constant 0 : index
    %c0_42 = arith.constant 0 : index
    %c145 = arith.constant 145 : index
    %39 = vector.load %arg5[%c0_41, %c0_42, %c145] : memref<1x4x512xf32, #tpu.memory_space<vmem>>, vector<1x4x16xf32>
    %40 = vector.shape_cast %39 : vector<1x4x16xf32> to vector<4x16xf32>
    %41 = vector.shape_cast %38 : vector<4x16xf32> to vector<1x4x16xf32>
    tpu.vector_store %arg5[%c0_41, %c0_42, %c145], %41 {strides = array<i32>} : memref<1x4x512xf32, #tpu.memory_space<vmem>>, vector<1x4x16xf32>,
    %c0_43 = arith.constant 0 : index
    %c0_44 = arith.constant 0 : index
    %c8 = arith.constant 8 : index
    %c0_45 = arith.constant 0 : index
    %42 = vector.load %arg1[%c0_43, %c0_44, %c8, %c0_45] : memref<1x4x16x16xf32, #tpu.memory_space<vmem>>, vector<1x4x1x16xf32>
    %43 = vector.shape_cast %42 : vector<1x4x1x16xf32> to vector<4x16xf32>
    %c0_46 = arith.constant 0 : index
    %c0_47 = arith.constant 0 : index
    %c163 = arith.constant 163 : index
    %44 = vector.load %arg5[%c0_46, %c0_47, %c163] : memref<1x4x512xf32, #tpu.memory_space<vmem>>, vector<1x4x16xf32>
    %45 = vector.shape_cast %44 : vector<1x4x16xf32> to vector<4x16xf32>
    %46 = vector.shape_cast %43 : vector<4x16xf32> to vector<1x4x16xf32>
    tpu.vector_store %arg5[%c0_46, %c0_47, %c163], %46 {strides = array<i32>} : memref<1x4x512xf32, #tpu.memory_space<vmem>>, vector<1x4x16xf32>,
    %c0_48 = arith.constant 0 : index
    %c0_49 = arith.constant 0 : index
    %c9 = arith.constant 9 : index
    %c0_50 = arith.constant 0 : index
    %47 = vector.load %arg1[%c0_48, %c0_49, %c9, %c0_50] : memref<1x4x16x16xf32, #tpu.memory_space<vmem>>, vector<1x4x1x16xf32>
    %48 = vector.shape_cast %47 : vector<1x4x1x16xf32> to vector<4x16xf32>
    %c0_51 = arith.constant 0 : index
    %c0_52 = arith.constant 0 : index
    %c181 = arith.constant 181 : index
    %49 = vector.load %arg5[%c0_51, %c0_52, %c181] : memref<1x4x512xf32, #tpu.memory_space<vmem>>, vector<1x4x16xf32>
    %50 = vector.shape_cast %49 : vector<1x4x16xf32> to vector<4x16xf32>
    %51 = vector.shape_cast %48 : vector<4x16xf32> to vector<1x4x16xf32>
    tpu.vector_store %arg5[%c0_51, %c0_52, %c181], %51 {strides = array<i32>} : memref<1x4x512xf32, #tpu.memory_space<vmem>>, vector<1x4x16xf32>,
    %c0_53 = arith.constant 0 : index
    %c0_54 = arith.constant 0 : index
    %c10 = arith.constant 10 : index
    %c0_55 = arith.constant 0 : index
    %52 = vector.load %arg1[%c0_53, %c0_54, %c10, %c0_55] : memref<1x4x16x16xf32, #tpu.memory_space<vmem>>, vector<1x4x1x16xf32>
    %53 = vector.shape_cast %52 : vector<1x4x1x16xf32> to vector<4x16xf32>
    %c0_56 = arith.constant 0 : index
    %c0_57 = arith.constant 0 : index
    %c199 = arith.constant 199 : index
    %54 = vector.load %arg5[%c0_56, %c0_57, %c199] : memref<1x4x512xf32, #tpu.memory_space<vmem>>, vector<1x4x16xf32>
    %55 = vector.shape_cast %54 : vector<1x4x16xf32> to vector<4x16xf32>
    %56 = vector.shape_cast %53 : vector<4x16xf32> to vector<1x4x16xf32>
    tpu.vector_store %arg5[%c0_56, %c0_57, %c199], %56 {strides = array<i32>} : memref<1x4x512xf32, #tpu.memory_space<vmem>>, vector<1x4x16xf32>,
    %c0_58 = arith.constant 0 : index
    %c0_59 = arith.constant 0 : index
    %c11 = arith.constant 11 : index
    %c0_60 = arith.constant 0 : index
    %57 = vector.load %arg1[%c0_58, %c0_59, %c11, %c0_60] : memref<1x4x16x16xf32, #tpu.memory_space<vmem>>, vector<1x4x1x16xf32>
    %58 = vector.shape_cast %57 : vector<1x4x1x16xf32> to vector<4x16xf32>
    %c0_61 = arith.constant 0 : index
    %c0_62 = arith.constant 0 : index
    %c217 = arith.constant 217 : index
    %59 = vector.load %arg5[%c0_61, %c0_62, %c217] : memref<1x4x512xf32, #tpu.memory_space<vmem>>, vector<1x4x16xf32>
    %60 = vector.shape_cast %59 : vector<1x4x16xf32> to vector<4x16xf32>
    %61 = vector.shape_cast %58 : vector<4x16xf32> to vector<1x4x16xf32>
    tpu.vector_store %arg5[%c0_61, %c0_62, %c217], %61 {strides = array<i32>} : memref<1x4x512xf32, #tpu.memory_space<vmem>>, vector<1x4x16xf32>,
    %c0_63 = arith.constant 0 : index
    %c0_64 = arith.constant 0 : index
    %c12 = arith.constant 12 : index
    %c0_65 = arith.constant 0 : index
    %62 = vector.load %arg1[%c0_63, %c0_64, %c12, %c0_65] : memref<1x4x16x16xf32, #tpu.memory_space<vmem>>, vector<1x4x1x16xf32>
    %63 = vector.shape_cast %62 : vector<1x4x1x16xf32> to vector<4x16xf32>
    %c0_66 = arith.constant 0 : index
    %c0_67 = arith.constant 0 : index
    %c235 = arith.constant 235 : index
    %64 = vector.load %arg5[%c0_66, %c0_67, %c235] : memref<1x4x512xf32, #tpu.memory_space<vmem>>, vector<1x4x16xf32>
    %65 = vector.shape_cast %64 : vector<1x4x16xf32> to vector<4x16xf32>
    %66 = vector.shape_cast %63 : vector<4x16xf32> to vector<1x4x16xf32>
    tpu.vector_store %arg5[%c0_66, %c0_67, %c235], %66 {strides = array<i32>} : memref<1x4x512xf32, #tpu.memory_space<vmem>>, vector<1x4x16xf32>,
    %c0_68 = arith.constant 0 : index
    %c0_69 = arith.constant 0 : index
    %c13 = arith.constant 13 : index
    %c0_70 = arith.constant 0 : index
    %67 = vector.load %arg1[%c0_68, %c0_69, %c13, %c0_70] : memref<1x4x16x16xf32, #tpu.memory_space<vmem>>, vector<1x4x1x16xf32>
    %68 = vector.shape_cast %67 : vector<1x4x1x16xf32> to vector<4x16xf32>
    %c0_71 = arith.constant 0 : index
    %c0_72 = arith.constant 0 : index
    %c253 = arith.constant 253 : index
    %69 = vector.load %arg5[%c0_71, %c0_72, %c253] : memref<1x4x512xf32, #tpu.memory_space<vmem>>, vector<1x4x16xf32>
    %70 = vector.shape_cast %69 : vector<1x4x16xf32> to vector<4x16xf32>
    %71 = vector.shape_cast %68 : vector<4x16xf32> to vector<1x4x16xf32>
    tpu.vector_store %arg5[%c0_71, %c0_72, %c253], %71 {strides = array<i32>} : memref<1x4x512xf32, #tpu.memory_space<vmem>>, vector<1x4x16xf32>,
    %c0_73 = arith.constant 0 : index
    %c0_74 = arith.constant 0 : index
    %c14 = arith.constant 14 : index
    %c0_75 = arith.constant 0 : index
    %72 = vector.load %arg1[%c0_73, %c0_74, %c14, %c0_75] : memref<1x4x16x16xf32, #tpu.memory_space<vmem>>, vector<1x4x1x16xf32>
    %73 = vector.shape_cast %72 : vector<1x4x1x16xf32> to vector<4x16xf32>
    %c0_76 = arith.constant 0 : index
    %c0_77 = arith.constant 0 : index
    %c271 = arith.constant 271 : index
    %74 = vector.load %arg5[%c0_76, %c0_77, %c271] : memref<1x4x512xf32, #tpu.memory_space<vmem>>, vector<1x4x16xf32>
    %75 = vector.shape_cast %74 : vector<1x4x16xf32> to vector<4x16xf32>
    %76 = vector.shape_cast %73 : vector<4x16xf32> to vector<1x4x16xf32>
    tpu.vector_store %arg5[%c0_76, %c0_77, %c271], %76 {strides = array<i32>} : memref<1x4x512xf32, #tpu.memory_space<vmem>>, vector<1x4x16xf32>,
    %c0_78 = arith.constant 0 : index
    %c0_79 = arith.constant 0 : index
    %c15 = arith.constant 15 : index
    %c0_80 = arith.constant 0 : index
    %77 = vector.load %arg1[%c0_78, %c0_79, %c15, %c0_80] : memref<1x4x16x16xf32, #tpu.memory_space<vmem>>, vector<1x4x1x16xf32>
    %78 = vector.shape_cast %77 : vector<1x4x1x16xf32> to vector<4x16xf32>
    %c0_81 = arith.constant 0 : index
    %c0_82 = arith.constant 0 : index
    %c289 = arith.constant 289 : index
    %79 = vector.load %arg5[%c0_81, %c0_82, %c289] : memref<1x4x512xf32, #tpu.memory_space<vmem>>, vector<1x4x16xf32>
    %80 = vector.shape_cast %79 : vector<1x4x16xf32> to vector<4x16xf32>
    %81 = vector.shape_cast %78 : vector<4x16xf32> to vector<1x4x16xf32>
    tpu.vector_store %arg5[%c0_81, %c0_82, %c289], %81 {strides = array<i32>} : memref<1x4x512xf32, #tpu.memory_space<vmem>>, vector<1x4x16xf32>,
    %c0_83 = arith.constant 0 : index
    %c0_84 = arith.constant 0 : index
    %c0_85 = arith.constant 0 : index
    %82 = vector.load %arg5[%c0_83, %c0_84, %c0_85] : memref<1x4x512xf32, #tpu.memory_space<vmem>>, vector<1x4x384xf32>
    %83 = vector.shape_cast %82 : vector<1x4x384xf32> to vector<4x384xf32>
    %84 = arith.truncf %83 : vector<4x384xf32> to vector<4x384xbf16>
    %c0_86 = arith.constant 0 : index
    %c0_87 = arith.constant 0 : index
    %85 = vector.load %arg6[%c0_86, %c0_87] : memref<36x384xbf16, #tpu.memory_space<vmem>>, vector<4x384xbf16>
    tpu.vector_store %arg6[%c0_86, %c0_87], %84 {strides = array<i32>} : memref<36x384xbf16, #tpu.memory_space<vmem>>, vector<4x384xbf16>,
    %c0_88 = arith.constant 0 : index
    %c0_89 = arith.constant 0 : index
    %c1_90 = arith.constant 1 : index
    %86 = vector.load %arg5[%c0_88, %c0_89, %c1_90] : memref<1x4x512xf32, #tpu.memory_space<vmem>>, vector<1x4x384xf32>
    %87 = vector.shape_cast %86 : vector<1x4x384xf32> to vector<4x384xf32>
    %88 = arith.truncf %87 : vector<4x384xf32> to vector<4x384xbf16>
    %c4_91 = arith.constant 4 : index
    %c0_92 = arith.constant 0 : index
    %89 = vector.load %arg6[%c4_91, %c0_92] : memref<36x384xbf16, #tpu.memory_space<vmem>>, vector<4x384xbf16>
    tpu.vector_store %arg6[%c4_91, %c0_92], %88 {strides = array<i32>} : memref<36x384xbf16, #tpu.memory_space<vmem>>, vector<4x384xbf16>,
    %c0_93 = arith.constant 0 : index
    %c0_94 = arith.constant 0 : index
    %c2_95 = arith.constant 2 : index
    %90 = vector.load %arg5[%c0_93, %c0_94, %c2_95] : memref<1x4x512xf32, #tpu.memory_space<vmem>>, vector<1x4x384xf32>
    %91 = vector.shape_cast %90 : vector<1x4x384xf32> to vector<4x384xf32>
    %92 = arith.truncf %91 : vector<4x384xf32> to vector<4x384xbf16>
    %c8_96 = arith.constant 8 : index
    %c0_97 = arith.constant 0 : index
    %93 = vector.load %arg6[%c8_96, %c0_97] : memref<36x384xbf16, #tpu.memory_space<vmem>>, vector<4x384xbf16>
    tpu.vector_store %arg6[%c8_96, %c0_97], %92 {strides = array<i32>} : memref<36x384xbf16, #tpu.memory_space<vmem>>, vector<4x384xbf16>,
    %c0_98 = arith.constant 0 : index
    %c0_99 = arith.constant 0 : index
    %c18 = arith.constant 18 : index
    %94 = vector.load %arg5[%c0_98, %c0_99, %c18] : memref<1x4x512xf32, #tpu.memory_space<vmem>>, vector<1x4x384xf32>
    %95 = vector.shape_cast %94 : vector<1x4x384xf32> to vector<4x384xf32>
    %96 = arith.truncf %95 : vector<4x384xf32> to vector<4x384xbf16>
    %c12_100 = arith.constant 12 : index
    %c0_101 = arith.constant 0 : index
    %97 = vector.load %arg6[%c12_100, %c0_101] : memref<36x384xbf16, #tpu.memory_space<vmem>>, vector<4x384xbf16>
    tpu.vector_store %arg6[%c12_100, %c0_101], %96 {strides = array<i32>} : memref<36x384xbf16, #tpu.memory_space<vmem>>, vector<4x384xbf16>,
    %c0_102 = arith.constant 0 : index
    %c0_103 = arith.constant 0 : index
    %c19_104 = arith.constant 19 : index
    %98 = vector.load %arg5[%c0_102, %c0_103, %c19_104] : memref<1x4x512xf32, #tpu.memory_space<vmem>>, vector<1x4x384xf32>
    %99 = vector.shape_cast %98 : vector<1x4x384xf32> to vector<4x384xf32>
    %100 = arith.truncf %99 : vector<4x384xf32> to vector<4x384xbf16>
    %c16 = arith.constant 16 : index
    %c0_105 = arith.constant 0 : index
    %101 = vector.load %arg6[%c16, %c0_105] : memref<36x384xbf16, #tpu.memory_space<vmem>>, vector<4x384xbf16>
    tpu.vector_store %arg6[%c16, %c0_105], %100 {strides = array<i32>} : memref<36x384xbf16, #tpu.memory_space<vmem>>, vector<4x384xbf16>,
    %c0_106 = arith.constant 0 : index
    %c0_107 = arith.constant 0 : index
    %c20 = arith.constant 20 : index
    %102 = vector.load %arg5[%c0_106, %c0_107, %c20] : memref<1x4x512xf32, #tpu.memory_space<vmem>>, vector<1x4x384xf32>
    %103 = vector.shape_cast %102 : vector<1x4x384xf32> to vector<4x384xf32>
    %104 = arith.truncf %103 : vector<4x384xf32> to vector<4x384xbf16>
    %c20_108 = arith.constant 20 : index
    %c0_109 = arith.constant 0 : index
    %105 = vector.load %arg6[%c20_108, %c0_109] : memref<36x384xbf16, #tpu.memory_space<vmem>>, vector<4x384xbf16>
    tpu.vector_store %arg6[%c20_108, %c0_109], %104 {strides = array<i32>} : memref<36x384xbf16, #tpu.memory_space<vmem>>, vector<4x384xbf16>,
    %c0_110 = arith.constant 0 : index
    %c0_111 = arith.constant 0 : index
    %c36 = arith.constant 36 : index
    %106 = vector.load %arg5[%c0_110, %c0_111, %c36] : memref<1x4x512xf32, #tpu.memory_space<vmem>>, vector<1x4x384xf32>
    %107 = vector.shape_cast %106 : vector<1x4x384xf32> to vector<4x384xf32>
    %108 = arith.truncf %107 : vector<4x384xf32> to vector<4x384xbf16>
    %c24 = arith.constant 24 : index
    %c0_112 = arith.constant 0 : index
    %109 = vector.load %arg6[%c24, %c0_112] : memref<36x384xbf16, #tpu.memory_space<vmem>>, vector<4x384xbf16>
    tpu.vector_store %arg6[%c24, %c0_112], %108 {strides = array<i32>} : memref<36x384xbf16, #tpu.memory_space<vmem>>, vector<4x384xbf16>,
    %c0_113 = arith.constant 0 : index
    %c0_114 = arith.constant 0 : index
    %c37_115 = arith.constant 37 : index
    %110 = vector.load %arg5[%c0_113, %c0_114, %c37_115] : memref<1x4x512xf32, #tpu.memory_space<vmem>>, vector<1x4x384xf32>
    %111 = vector.shape_cast %110 : vector<1x4x384xf32> to vector<4x384xf32>
    %112 = arith.truncf %111 : vector<4x384xf32> to vector<4x384xbf16>
    %c28 = arith.constant 28 : index
    %c0_116 = arith.constant 0 : index
    %113 = vector.load %arg6[%c28, %c0_116] : memref<36x384xbf16, #tpu.memory_space<vmem>>, vector<4x384xbf16>
    tpu.vector_store %arg6[%c28, %c0_116], %112 {strides = array<i32>} : memref<36x384xbf16, #tpu.memory_space<vmem>>, vector<4x384xbf16>,
    %c0_117 = arith.constant 0 : index
    %c0_118 = arith.constant 0 : index
    %c38 = arith.constant 38 : index
    %114 = vector.load %arg5[%c0_117, %c0_118, %c38] : memref<1x4x512xf32, #tpu.memory_space<vmem>>, vector<1x4x384xf32>
    %115 = vector.shape_cast %114 : vector<1x4x384xf32> to vector<4x384xf32>
    %116 = arith.truncf %115 : vector<4x384xf32> to vector<4x384xbf16>
    %c32 = arith.constant 32 : index
    %c0_119 = arith.constant 0 : index
    %117 = vector.load %arg6[%c32, %c0_119] : memref<36x384xbf16, #tpu.memory_space<vmem>>, vector<4x384xbf16>
    tpu.vector_store %arg6[%c32, %c0_119], %116 {strides = array<i32>} : memref<36x384xbf16, #tpu.memory_space<vmem>>, vector<4x384xbf16>,
    %c0_120 = arith.constant 0 : index
    %c0_121 = arith.constant 0 : index
    %118 = vector.load %arg2[%c0_120, %c0_121] : memref<8x36xbf16, #tpu.memory_space<vmem>>, vector<8x36xbf16>
    %c0_122 = arith.constant 0 : index
    %c0_123 = arith.constant 0 : index
    %119 = vector.load %arg6[%c0_122, %c0_123] : memref<36x384xbf16, #tpu.memory_space<vmem>>, vector<36x384xbf16>
    %cst_124 = arith.constant dense<0.000000e+00> : vector<8x384xf32>
    %120 = tpu.matmul %118, %119, %cst_124 {dimension_numbers = #tpu.dot_dimension_numbers<[1], [0], [0], [1], [0, 0, 1, 1], [], []>} : vector<8x36xbf16>, vector<36x384xbf16>, vector<8x384xf32> -> vector<8x384xf32>
    %c0_125 = arith.constant 0 : index
    %c0_126 = arith.constant 0 : index
    %121 = vector.load %arg3[%c0_125, %c0_126] : memref<1x384xf32, #tpu.memory_space<vmem>>, vector<1x384xf32>
    %122 = vector.broadcast %121 : vector<1x384xf32> to vector<8x384xf32>
    %123 = arith.mulf %120, %122 : vector<8x384xf32>
    %cst_127 = arith.constant dense<0.000000e+00> : vector<8xf32>
    %124 = vector.multi_reduction <add>, %123, %cst_127 [1] : vector<8x384xf32> to vector<8xf32>
    %125 = vector.shape_cast %124 : vector<8xf32> to vector<8x1xf32>
    %c0_128 = arith.constant 0 : index
    %c0_129 = arith.constant 0 : index
    %c0_130 = arith.constant 0 : index
    %126 = vector.load %arg4[%c0_128, %c0_129, %c0_130] : memref<1x8x2xf32, #tpu.memory_space<vmem>>, vector<1x8x1xf32>
    %127 = vector.shape_cast %126 : vector<1x8x1xf32> to vector<8x1xf32>
    %128 = vector.shape_cast %125 : vector<8x1xf32> to vector<1x8x1xf32>
    tpu.vector_store %arg4[%c0_128, %c0_129, %c0_130], %128 {strides = array<i32>} : memref<1x8x2xf32, #tpu.memory_space<vmem>>, vector<1x8x1xf32>,
    %129 = arith.mulf %123, %120 : vector<8x384xf32>
    %cst_131 = arith.constant dense<0.000000e+00> : vector<8xf32>
    %130 = vector.multi_reduction <add>, %129, %cst_131 [1] : vector<8x384xf32> to vector<8xf32>
    %131 = vector.shape_cast %130 : vector<8xf32> to vector<8x1xf32>
    %c0_132 = arith.constant 0 : index
    %c0_133 = arith.constant 0 : index
    %c1_134 = arith.constant 1 : index
    %132 = vector.load %arg4[%c0_132, %c0_133, %c1_134] : memref<1x8x2xf32, #tpu.memory_space<vmem>>, vector<1x8x1xf32>
    %133 = vector.shape_cast %132 : vector<1x8x1xf32> to vector<8x1xf32>
    %134 = vector.shape_cast %131 : vector<8x1xf32> to vector<1x8x1xf32>
    tpu.vector_store %arg4[%c0_132, %c0_133, %c1_134], %134 {strides = array<i32>} : memref<1x8x2xf32, #tpu.memory_space<vmem>>, vector<1x8x1xf32>,
    return
  }
  func.func @transform_0(%arg0: i32) -> (i32, i32, i32, i32) {
    %c0_i32 = arith.constant 0 : i32
    %c0_i32_0 = arith.constant 0 : i32
    %c0_i32_1 = arith.constant 0 : i32
    %c0_i32_2 = arith.constant 0 : i32
    return %arg0, %c0_i32, %c0_i32_0, %c0_i32_1 : i32, i32, i32, i32
  }
  func.func @transform_1(%arg0: i32) -> (i32, i32) {
    %c0_i32 = arith.constant 0 : i32
    %c0_i32_0 = arith.constant 0 : i32
    %c0_i32_1 = arith.constant 0 : i32
    return %c0_i32, %c0_i32_0 : i32, i32
  }
  func.func @transform_2(%arg0: i32) -> (i32, i32) {
    %c0_i32 = arith.constant 0 : i32
    %c0_i32_0 = arith.constant 0 : i32
    %c0_i32_1 = arith.constant 0 : i32
    return %c0_i32, %c0_i32_0 : i32, i32
  }
  func.func @transform_3(%arg0: i32) -> (i32, i32, i32) {
    %c0_i32 = arith.constant 0 : i32
    %c0_i32_0 = arith.constant 0 : i32
    %c0_i32_1 = arith.constant 0 : i32
    return %arg0, %c0_i32, %c0_i32_0 : i32, i32, i32
  }
}

</mosaic_0001>

<bundles_post_ra>
// kernel: conv_block_forward.3
= control target key start
LH: loop header
LB: loop body
LE: loop exit
PB: predicated region body
PF: predicated region fallthrough
CT: control target
= control target key end

     0   :  { %s1289_s15 = smov 0   ;;  %s1507_s0 = inlined_call_operand.vmem [shape: f32[2,4,16,16], index: 0, kind: input, shape index: {}]   ;;  %s1508_s1 = inlined_call_operand.vmem [shape: bf16[8,36], index: 1, kind: input, shape index: {}]   ;;  %s1509_s2 = inlined_call_operand.vmem [shape: f32[8,1], index: 2, kind: input, shape index: {}]   ;;  %s1510_s3 = inlined_call_operand.vmem [shape: f32[8,1], index: 3, kind: input, shape index: {}]   ;;  %s1511_s4 = inlined_call_operand.vmem [shape: f32[2,8,384], index: 4, kind: output, shape index: {}]  }
   0x1 LB: > { %s1111_s16 = sadd.s32 4294967295, %s1238_s15   ;;  %p1115_p0 = scmp.ge.s32.totalorder %s1238_s15, 1  ;;  %s1238_s15 = sphi %s1289_s15, %s14_s15  }
   0x2   : > { %p162_p1 = scmp.lt.s32.totalorder %s1238_s15, 3 }
   0x4   : > { %p163_p2 = pnand %p1115_p0, %p162_p1 }
   0x5   : > { %p188_p3 = scmp.lt.s32.totalorder (!%p163_p2), %s1111_s16, 1  ;;  %v1240_v0 = vmov (!%p163_p2), 0.0   ;;  %vm210_vm0 = vcmask (!%p163_p2), 1041409   ;;  %vm212_vm1 = vcmask (!%p163_p2), 1045509   ;;  %vm215_vm2 = vcmask (!%p163_p2), 1042434   ;;  %s1241_s21 = smov (!%p163_p2), 55  }
   0x6   : > { %166 = sbr.rel (%p163_p2) target bundleno = 567 (0x237), region = 36  ;;  %199 = vst [vmem:[#allocation2] sm:$0xff] (!%p163_p2), %v1240_v0  ;;  %200 = vst [vmem:[#allocation2 + $0x8] sm:$0xff] (!%p163_p2), %v1240_v0  ;;  %1174 = vmatprep.subr.bf16.mxu1 (!%p163_p2), %v1240_v0  ;;  %vm217_vm3 = vcmask (!%p163_p2), 1046534   ;;  %vm220_vm4 = vcmask (!%p163_p2), 1043459   ;;  %vm222_vm5 = vcmask (!%p163_p2), 1047559  }
   0x7   : > { %s1242_s22 = smov (!%p163_p2), 19   ;;  %s1243_s23 = smov (!%p163_p2), 73   ;;  %vm227_vm6 = vcmask (!%p163_p2), 281752   ;;  %vm249_vm7 = vcmask (!%p163_p2), 429352   ;;  %vm271_vm8 = vcmask (!%p163_p2), 576952   ;;  %vm293_vm9 = vcmask (!%p163_p2), 724552  }
   0x8   : > { %s1244_s24 = smov (!%p163_p2), 37   ;;  %s1245_s25 = smov (!%p163_p2), 91   ;;  %vm315_vm10 = vcmask (!%p163_p2), 872152   ;;  %vm362_vm11 = vcmask (!%p163_p2), 1044472   ;;  %vm363_vm12 = vcmask (!%p163_p2), 121860   ;;  %vm359_vm13 = vcmask (!%p163_p2), 1039360  }
   0x9   : > { %s1246_s26 = smov (!%p163_p2), 127   ;;  %s1247_s27 = smov (!%p163_p2), 17   ;;  %vm337_vm14 = vcmask (!%p163_p2), 1019752   ;;  %vm364_vm15 = vmor (!%p163_p2), %vm363_vm12, %vm362_vm11  ;;  %vm567_vm11 = vcmask (!%p163_p2), 396552   ;;  %vm1262_vm12 = vmmov (!%p163_p2), 0  }
   0xa   : > { %s1248_s28 = smov (!%p163_p2), 109   ;;  %s1249_s29 = smov (!%p163_p2), 53   ;;  %1180 = vmatprep.mubr.msk.bf16.mxu1 (!%p163_p2), %vm1262_vm12, %v1240_v0 }
   0xb   : > { %s1250_s30 = smov (!%p163_p2), 35   ;;  %s1251_s5 = smov (!%p163_p2), 125  }
   0xc   : > { %s1252_s6 = smov (!%p163_p2), 71   ;;  %s1253_s7 = smov (!%p163_p2), 89  }
   0xd   : > { %s1513_s16 = smov (!%p188_p3, %s1111_s16), 1  ;;  %s1254_s8 = smov 107  }
   0xe   : > { %s1151_s17 = sshll.u32 %s1513_s16, 6  ;;  %s1255_s9 = smov 15  }
   0xf   : > { %s1306_s20 = scalar_lea.vmem %s1507_s0, %s1151_s17  ;;  %s1256_s10 = smov 33  }
  0x10   : > { %v251_v1 = vld [vmem:[%s1306_s20 + $0x2] sm:$0x1]  ;;  %v252_v2 = vld [vmem:[%s1306_s20 + $0x12] sm:$0x1]  ;;  %v201_v7 = vld [vmem:[%s1306_s20] sm:$0x1] }
  0x11   : > { %v253_v3 = vld [vmem:[%s1306_s20 + $0x22] sm:$0x1]  ;;  %v254_v4 = vld [vmem:[%s1306_s20 + $0x32] sm:$0x1]  ;;  %v259_v5 = vrot.slane %v252_v2, 7  ;;  %s1257_s11 = smov 126  }
  0x12   : > { %v262_v6 = vrot.slane %v253_v3, 6  ;;  %v265_v8 = vrot.slane %v254_v4, 5  ;;  %v202_v9 = vld [vmem:[%s1306_s20 + $0x10] sm:$0x1]  ;;  %v203_v10 = vld [vmem:[%s1306_s20 + $0x20] sm:$0x1] }
  0x13   : > { %v260_v11 = vsel %vm210_vm0, %v259_v5, %v251_v1  ;;  %v204_v12 = vld [vmem:[%s1306_s20 + $0x30] sm:$0x1]  ;;  %v209_v13 = vrot.slane %v202_v9, 7  ;;  %v214_v14 = vrot.slane %v203_v10, 6  ;;  %v273_v15 = vld [vmem:[%s1306_s20 + $0x3] sm:$0x1] }
  0x14   : > { %v261_v16 = vsel %vm212_vm1, %v259_v5, %v260_v11  ;;  %v219_v17 = vrot.slane %v204_v12, 5  ;;  %v274_v18 = vld [vmem:[%s1306_s20 + $0x13] sm:$0x1]  ;;  %v275_v19 = vld [vmem:[%s1306_s20 + $0x23] sm:$0x1]  ;;  %s1258_s12 = smov 92  }
  0x15   : > { %v263_v20 = vsel %vm215_vm2, %v262_v6, %v261_v16  ;;  %v211_v21 = vsel %vm210_vm0, %v209_v13, %v201_v7  ;;  %v276_v22 = vld [vmem:[%s1306_s20 + $0x33] sm:$0x1]  ;;  %v281_v23 = vrot.slane %v274_v18, 7  ;;  %v284_v24 = vrot.slane %v275_v19, 6  ;;  %v229_v25 = vld [vmem:[%s1306_s20 + $0x1] sm:$0x1] }
  0x16   : > { %v264_v26 = vsel %vm217_vm3, %v262_v6, %v263_v20  ;;  %v213_v27 = vsel %vm212_vm1, %v209_v13, %v211_v21  ;;  %v287_v28 = vrot.slane %v276_v22, 5  ;;  %v230_v29 = vld [vmem:[%s1306_s20 + $0x11] sm:$0x1]  ;;  %v231_v30 = vld [vmem:[%s1306_s20 + $0x21] sm:$0x1]  ;;  %s1259_s13 = smov 110  }
  0x17   : > { %v266_v31 = vsel %vm220_vm4, %v265_v8, %v264_v26  ;;  %v216_v32 = vsel %vm215_vm2, %v214_v14, %v213_v27  ;;  %v282_v33 = vsel %vm210_vm0, %v281_v23, %v273_v15  ;;  %v232_v34 = vld [vmem:[%s1306_s20 + $0x31] sm:$0x1]  ;;  %v237_v35 = vrot.slane %v230_v29, 7  ;;  %v296_v40 = vld [vmem:[%s1306_s20 + $0x14] sm:$0x1]  ;;  %s1260_s14 = smov 108  }
  0x18   : > { %v267_v36 = vsel %vm222_vm5, %v265_v8, %v266_v31  ;;  %v218_v37 = vsel %vm217_vm3, %v214_v14, %v216_v32  ;;  %v283_v38 = vsel %vm212_vm1, %v281_v23, %v282_v33  ;;  %v240_v39 = vrot.slane %v231_v30, 6  ;;  %v297_v41 = vld [vmem:[%s1306_s20 + $0x24] sm:$0x1]  ;;  %v298_v47 = vld [vmem:[%s1306_s20 + $0x34] sm:$0x1]  ;;  %s1261_s17 = smov 90  }
  0x19   : > { %268 = vrot.lane.b32.xlu1 %v267_v36, %s1241_s21  ;;  %v221_v42 = vsel %vm220_vm4, %v219_v17, %v218_v37  ;;  %v285_v43 = vsel %vm215_vm2, %v284_v24, %v283_v38  ;;  %v238_v44 = vsel %vm210_vm0, %v237_v35, %v229_v25  ;;  %v243_v45 = vrot.slane %v232_v34, 5  ;;  %v295_v46 = vld [vmem:[%s1306_s20 + $0x4] sm:$0x1]  ;;  %v340_v52 = vld [vmem:[%s1306_s20 + $0x16] sm:$0x1] }
  0x1a   : > { %v223_v48 = vsel %vm222_vm5, %v219_v17, %v221_v42  ;;  %v286_v49 = vsel %vm217_vm3, %v284_v24, %v285_v43  ;;  %v239_v50 = vsel %vm212_vm1, %v237_v35, %v238_v44  ;;  %v303_v51 = vrot.slane %v296_v40, 7  ;;  %v341_v53 = vld [vmem:[%s1306_s20 + $0x26] sm:$0x1]  ;;  %v342_v59 = vld [vmem:[%s1306_s20 + $0x36] sm:$0x1] }
  0x1b   : > { %224 = vrot.lane.b32.xlu0 %v223_v48, %s1242_s22  ;;  %v288_v54 = vsel %vm220_vm4, %v287_v28, %v286_v49  ;;  %v241_v55 = vsel %vm215_vm2, %v240_v39, %v239_v50  ;;  %v306_v56 = vrot.slane %v297_v41, 6  ;;  %v309_v57 = vrot.slane %v298_v47, 5  ;;  %v339_v58 = vld [vmem:[%s1306_s20 + $0x6] sm:$0x1]  ;;  %v367_v1 = vld [vmem:[%s1306_s20 + $0x17] sm:$0x1] }
  0x1c   : > { %v289_v60 = vsel %vm222_vm5, %v287_v28, %v288_v54  ;;  %v242_v61 = vsel %vm217_vm3, %v240_v39, %v241_v55  ;;  %v304_v62 = vsel %vm210_vm0, %v303_v51, %v295_v46  ;;  %v347_v63 = vrot.slane %v340_v52, 7  ;;  %v368_v2 = vld [vmem:[%s1306_s20 + $0x27] sm:$0x1]  ;;  %v369_v8 = vld [vmem:[%s1306_s20 + $0x37] sm:$0x1] }
  0x1d   : > { %290 = vrot.lane.b32.xlu1 %v289_v60, %s1243_s23  ;;  %v244_v3 = vsel %vm220_vm4, %v243_v45, %v242_v61  ;;  %v305_v4 = vsel %vm212_vm1, %v303_v51, %v304_v62  ;;  %v350_v5 = vrot.slane %v341_v53, 6  ;;  %v353_v6 = vrot.slane %v342_v59, 5  ;;  %v366_v7 = vld [vmem:[%s1306_s20 + $0x7] sm:$0x1]  ;;  %v318_v13 = vld [vmem:[%s1306_s20 + $0x15] sm:$0x1] }
  0x1e   : > { %v245_v9 = vsel %vm222_vm5, %v243_v45, %v244_v3  ;;  %v307_v10 = vsel %vm215_vm2, %v306_v56, %v305_v4  ;;  %v348_v11 = vsel %vm210_vm0, %v347_v63, %v339_v58  ;;  %v374_v12 = vrot.slane %v367_v1, 7  ;;  %v319_v14 = vld [vmem:[%s1306_s20 + $0x25] sm:$0x1]  ;;  %v320_v20 = vld [vmem:[%s1306_s20 + $0x35] sm:$0x1] }
  0x1f   : > { %246 = vrot.lane.b32.xlu0 %v245_v9, %s1244_s24  ;;  %v308_v15 = vsel %vm217_vm3, %v306_v56, %v307_v10  ;;  %v349_v16 = vsel %vm212_vm1, %v347_v63, %v348_v11  ;;  %v377_v17 = vrot.slane %v368_v2, 6  ;;  %v380_v18 = vrot.slane %v369_v8, 5  ;;  %v317_v19 = vld [vmem:[%s1306_s20 + $0x5] sm:$0x1]  ;;  %v411_v25 = vld [vmem:[%s1306_s20 + $0x19] sm:$0x1] }
  0x20   : > { %v310_v21 = vsel %vm220_vm4, %v309_v57, %v308_v15  ;;  %v351_v22 = vsel %vm215_vm2, %v350_v5, %v349_v16  ;;  %v375_v23 = vsel %vm210_vm0, %v374_v12, %v366_v7  ;;  %v325_v24 = vrot.slane %v318_v13, 7  ;;  %v412_v30 = vld [vmem:[%s1306_s20 + $0x29] sm:$0x1]  ;;  %v413_v31 = vld [vmem:[%s1306_s20 + $0x39] sm:$0x1]  ;;  %s1184_s24 = smul.u32 24, %s1513_s16 }
  0x21   : > { %v311_v26 = vsel %vm222_vm5, %v309_v57, %v310_v21  ;;  %v352_v27 = vsel %vm217_vm3, %v350_v5, %v351_v22  ;;  %v376_v28 = vsel %vm212_vm1, %v374_v12, %v375_v23  ;;  %v328_v29 = vrot.slane %v319_v14, 6  ;;  %v410_v36 = vld [vmem:[%s1306_s20 + $0x9] sm:$0x1]  ;;  %v389_v37 = vld [vmem:[%s1306_s20 + $0x18] sm:$0x1] }
  0x22   : > { %312 = vrot.lane.b32.xlu1 %v311_v26, %s1245_s25  ;;  %v354_v32 = vsel %vm220_vm4, %v353_v6, %v352_v27  ;;  %v378_v33 = vsel %vm215_vm2, %v377_v17, %v376_v28  ;;  %v326_v34 = vsel %vm210_vm0, %v325_v24, %v317_v19  ;;  %v331_v35 = vrot.slane %v320_v20, 5  ;;  %v390_v42 = vld [vmem:[%s1306_s20 + $0x28] sm:$0x1]  ;;  %v391_v43 = vld [vmem:[%s1306_s20 + $0x38] sm:$0x1] }
  0x23   : > { %v355_v38 = vsel %vm222_vm5, %v353_v6, %v354_v32  ;;  %v379_v39 = vsel %vm217_vm3, %v377_v17, %v378_v33  ;;  %v327_v40 = vsel %vm212_vm1, %v325_v24, %v326_v34  ;;  %v418_v41 = vrot.slane %v411_v25, 7  ;;  %v388_v48 = vld [vmem:[%s1306_s20 + $0x8] sm:$0x1]  ;;  %v499_v49 = vld [vmem:[%s1306_s20 + $0x1d] sm:$0x1] }
  0x24   : > { %356 = vrot.lane.b32.xlu0 %v355_v38, %s1246_s26  ;;  %v381_v44 = vsel %vm220_vm4, %v380_v18, %v379_v39  ;;  %v329_v45 = vsel %vm215_vm2, %v328_v29, %v327_v40  ;;  %v421_v46 = vrot.slane %v412_v30, 6  ;;  %v424_v47 = vrot.slane %v413_v31, 5  ;;  %v500_v54 = vld [vmem:[%s1306_s20 + $0x2d] sm:$0x1]  ;;  %v501_v55 = vld [vmem:[%s1306_s20 + $0x3d] sm:$0x1] }
  0x25   : > { %v382_v50 = vsel %vm222_vm5, %v380_v18, %v381_v44  ;;  %v330_v51 = vsel %vm217_vm3, %v328_v29, %v329_v45  ;;  %v419_v52 = vsel %vm210_vm0, %v418_v41, %v410_v36  ;;  %v396_v53 = vrot.slane %v389_v37, 7  ;;  %v498_v60 = vld [vmem:[%s1306_s20 + $0xd] sm:$0x1]  ;;  %v433_v61 = vld [vmem:[%s1306_s20 + $0x1a] sm:$0x1] }
  0x26   : > { %383 = vrot.lane.b32.xlu1 %v382_v50, %s1247_s27  ;;  %v332_v56 = vsel %vm220_vm4, %v331_v35, %v330_v51  ;;  %v420_v57 = vsel %vm212_vm1, %v418_v41, %v419_v52  ;;  %v399_v58 = vrot.slane %v390_v42, 6  ;;  %v402_v59 = vrot.slane %v391_v43, 5  ;;  %v434_v3 = vld [vmem:[%s1306_s20 + $0x2a] sm:$0x1]  ;;  %v435_v9 = vld [vmem:[%s1306_s20 + $0x3a] sm:$0x1]  ;;  %s197_s27 = scalar_lea.vmem %s1511_s4, %s1184_s24 }
  0x27   : > { %v333_v62 = vsel %vm222_vm5, %v331_v35, %v332_v56  ;;  %v422_v63 = vsel %vm215_vm2, %v421_v46, %v420_v57  ;;  %v397_v1 = vsel %vm210_vm0, %v396_v53, %v388_v48  ;;  %v506_v2 = vrot.slane %v499_v49, 7  ;;  %v432_v8 = vld [vmem:[%s1306_s20 + $0xa] sm:$0x1]  ;;  %v455_v14 = vld [vmem:[%s1306_s20 + $0x1b] sm:$0x1] }
  0x28   : > { %334 = vrot.lane.b32.xlu0 %v333_v62, %s1248_s28  ;;  %v423_v4 = vsel %vm217_vm3, %v421_v46, %v422_v63  ;;  %v398_v5 = vsel %vm212_vm1, %v396_v53, %v397_v1  ;;  %v509_v6 = vrot.slane %v500_v54, 6  ;;  %v512_v7 = vrot.slane %v501_v55, 5  ;;  %v456_v19 = vld [vmem:[%s1306_s20 + $0x2b] sm:$0x1]  ;;  %v457_v20 = vld [vmem:[%s1306_s20 + $0x3b] sm:$0x1] }
  0x29   : > { %v425_v10 = vsel %vm220_vm4, %v424_v47, %v423_v4  ;;  %v400_v11 = vsel %vm215_vm2, %v399_v58, %v398_v5  ;;  %v507_v12 = vsel %vm210_vm0, %v506_v2, %v498_v60  ;;  %v440_v13 = vrot.slane %v433_v61, 7  ;;  %v454_v25 = vld [vmem:[%s1306_s20 + $0xb] sm:$0x1]  ;;  %v477_v26 = vld [vmem:[%s1306_s20 + $0x1c] sm:$0x1] }
  0x2a   : > { %v426_v15 = vsel %vm222_vm5, %v424_v47, %v425_v10  ;;  %v401_v16 = vsel %vm217_vm3, %v399_v58, %v400_v11  ;;  %v508_v17 = vsel %vm212_vm1, %v506_v2, %v507_v12  ;;  %v443_v18 = vrot.slane %v434_v3, 6  ;;  %v478_v31 = vld [vmem:[%s1306_s20 + $0x2c] sm:$0x1]  ;;  %v479_v32 = vld [vmem:[%s1306_s20 + $0x3c] sm:$0x1] }
  0x2b   : > { %427 = vrot.lane.b32.xlu1 %v426_v15, %s1249_s29  ;;  %v403_v21 = vsel %vm220_vm4, %v402_v59, %v401_v16  ;;  %v510_v22 = vsel %vm215_vm2, %v509_v6, %v508_v17  ;;  %v441_v23 = vsel %vm210_vm0, %v440_v13, %v432_v8  ;;  %v446_v24 = vrot.slane %v435_v9, 5  ;;  %v476_v37 = vld [vmem:[%s1306_s20 + $0xc] sm:$0x1]  ;;  %v526_v38 = vld [vmem:[%s1306_s20 + $0x1e] sm:$0x1] }
  0x2c   : > { %v404_v27 = vsel %vm222_vm5, %v402_v59, %v403_v21  ;;  %v511_v28 = vsel %vm217_vm3, %v509_v6, %v510_v22  ;;  %v442_v29 = vsel %vm212_vm1, %v440_v13, %v441_v23  ;;  %v462_v30 = vrot.slane %v455_v14, 7  ;;  %v527_v43 = vld [vmem:[%s1306_s20 + $0x2e] sm:$0x1]  ;;  %v528_v44 = vld [vmem:[%s1306_s20 + $0x3e] sm:$0x1] }
  0x2d   : > { %405 = vrot.lane.b32.xlu0 %v404_v27, %s1250_s30  ;;  %v513_v33 = vsel %vm220_vm4, %v512_v7, %v511_v28  ;;  %v444_v34 = vsel %vm215_vm2, %v443_v18, %v442_v29  ;;  %v465_v35 = vrot.slane %v456_v19, 6  ;;  %v468_v36 = vrot.slane %v457_v20, 5  ;;  %v525_v49 = vld [vmem:[%s1306_s20 + $0xe] sm:$0x1]  ;;  %v548_v50 = vld [vmem:[%s1306_s20 + $0x1f] sm:$0x1] }
  0x2e   : > { %v514_v39 = vsel %vm222_vm5, %v512_v7, %v513_v33  ;;  %v445_v40 = vsel %vm217_vm3, %v443_v18, %v444_v34  ;;  %v463_v41 = vsel %vm210_vm0, %v462_v30, %v454_v25  ;;  %v484_v42 = vrot.slane %v477_v26, 7  ;;  %v549_v55 = vld [vmem:[%s1306_s20 + $0x2f] sm:$0x1]  ;;  %v550_v61 = vld [vmem:[%s1306_s20 + $0x3f] sm:$0x1] }
  0x2f   : > { %515 = vrot.lane.b32.xlu1 %v514_v39, %s1251_s5  ;;  %v447_v45 = vsel %vm220_vm4, %v446_v24, %v445_v40  ;;  %v464_v46 = vsel %vm212_vm1, %v462_v30, %v463_v41  ;;  %v487_v47 = vrot.slane %v478_v31, 6  ;;  %v490_v48 = vrot.slane %v479_v32, 5  ;;  %v547_v60 = vld [vmem:[%s1306_s20 + $0xf] sm:$0x1] }
  0x30   : > { %v448_v51 = vsel %vm222_vm5, %v446_v24, %v447_v45  ;;  %v466_v52 = vsel %vm215_vm2, %v465_v35, %v464_v46  ;;  %v485_v53 = vsel %vm210_vm0, %v484_v42, %v476_v37  ;;  %v533_v54 = vrot.slane %v526_v38, 7 }
  0x31   : > { %449 = vrot.lane.b32.xlu0 %v448_v51, %s1252_s6  ;;  %v467_v56 = vsel %vm217_vm3, %v465_v35, %v466_v52  ;;  %v486_v57 = vsel %vm212_vm1, %v484_v42, %v485_v53  ;;  %v536_v58 = vrot.slane %v527_v43, 6  ;;  %v539_v59 = vrot.slane %v528_v44, 5  ;;  %v1032_v51 = vld [vmem:[%s1509_s2] sm:$0xff] }
  0x32   : > { %v469_v62 = vsel %vm220_vm4, %v468_v36, %v467_v56  ;;  %v488_v63 = vsel %vm215_vm2, %v487_v47, %v486_v57  ;;  %v534_v1 = vsel %vm210_vm0, %v533_v54, %v525_v49  ;;  %v555_v2 = vrot.slane %v548_v50, 7  ;;  %v1041_v52 = vld [vmem:[%s1510_s3] sm:$0xff] }
  0x33   : > { %v470_v3 = vsel %vm222_vm5, %v468_v36, %v469_v62  ;;  %v489_v4 = vsel %vm217_vm3, %v487_v47, %v488_v63  ;;  %v535_v5 = vsel %vm212_vm1, %v533_v54, %v534_v1  ;;  %v558_v6 = vrot.slane %v549_v55, 6 }
  0x34   : > { %v491_v7 = vsel %vm220_vm4, %v490_v48, %v489_v4  ;;  %v537_v8 = vsel %vm215_vm2, %v536_v58, %v535_v5  ;;  %v556_v9 = vsel %vm210_vm0, %v555_v2, %v547_v60  ;;  %v561_v10 = vrot.slane %v550_v61, 5 }
  0x35   : > { %471 = vrot.lane.b32.xlu0 %v470_v3, %s1253_s7  ;;  %v492_v11 = vsel %vm222_vm5, %v490_v48, %v491_v7  ;;  %v538_v12 = vsel %vm217_vm3, %v536_v58, %v537_v8  ;;  %v557_v13 = vsel %vm212_vm1, %v555_v2, %v556_v9  ;;  %vm386_vm0 = vcmask 265352  }
  0x36   : > { %493 = vrot.lane.b32.xlu1 %v492_v11, %s1254_s8  ;;  %v540_v14 = vsel %vm220_vm4, %v539_v59, %v538_v12  ;;  %v559_v15 = vsel %vm215_vm2, %v558_v6, %v557_v13  ;;  %vm408_vm1 = vcmask 412952   ;;  %vm430_vm2 = vcmask 560552  }
  0x37   : > { %v541_v16 = vsel %vm222_vm5, %v539_v59, %v540_v14  ;;  %v560_v17 = vsel %vm217_vm3, %v558_v6, %v559_v15  ;;  %vm452_vm3 = vcmask 708152   ;;  %v1263_v50 = vmov 0  }
  0x38   : > { %v562_v18 = vsel %vm220_vm4, %v561_v10, %v560_v17  ;;  %vm521_vm4 = vcmask 1044456   ;;  %983 = vmatprep.mubr.bf16.mxu0 %v1263_v50  ;;  %1217 = vset.pattern.permute.xlu0 %v1263_v50 }
  0x39   : > { %542 = vrot.lane.b32.xlu0 %v541_v16, %s1255_s9  ;;  %v563_v19 = vsel %vm222_vm5, %v561_v10, %v562_v18  ;;  %vm522_vm5 = vcmask 105476   ;;  %1218 = vset.pattern.permute.xlu1 %v1263_v50 }
  0x3a   : > { %564 = vrot.lane.b32.xlu1 %v563_v19, %s1256_s10 }
  0x8b   : > { %v269_v20 = vpop.permute.xlu1 %268 }
  0x8d   : > { %v225_v21 = vpop.permute.xlu0 %224 }
  0x8e   : > { %228 = vst.msk [vmem:[#allocation2] sm:$0xf] %vm227_vm6, %v225_v21  ;;  %vm474_vm6 = vcmask 855752  }
  0x8f   : > { %v291_v22 = vpop.permute.xlu1 %290 }
  0x91   : > { %v247_v23 = vpop.permute.xlu0 %246 }
  0x92   : > { %250 = vst.msk [vmem:[#allocation2] sm:$0xf] %vm249_vm7, %v247_v23  ;;  %vm518_vm7 = vcmask 1022976  }
  0x93   : > { %272 = vst.msk [vmem:[#allocation2] sm:$0xf] %vm271_vm8, %v269_v20  ;;  %vm496_vm8 = vcmask 1003352  }
  0x94   : > { %v313_v24 = vpop.permute.xlu1 %312  ;;  %294 = vst.msk [vmem:[#allocation2] sm:$0xf] %vm293_vm9, %v291_v22  ;;  %vm523_vm9 = vmor %vm522_vm5, %vm521_vm4  ;;  %vm879_vm4 = vcmask 736256   ;;  %vm941_vm5 = vcmask 1041408  }
  0x95   : > { %316 = vst.msk [vmem:[#allocation2] sm:$0xf] %vm315_vm10, %v313_v24  ;;  %vm545_vm10 = vcmask 248952  }
  0x96   : > { %v357_v25 = vpop.permute.xlu0 %356 }
  0x97   : > { %v358_v26 = vrot.slane %v357_v25, 4 }
  0x98   : > { %v384_v27 = vpop.permute.xlu1 %383 }
  0x99   : > { %v360_v29 = vsel %vm359_vm13, %v358_v26, %v357_v25 }
  0x9a   : > { %v335_v28 = vpop.permute.xlu0 %334 }
  0x9b   : > { %338 = vst.msk [vmem:[#allocation2] sm:$0xf] %vm337_vm14, %v335_v28  ;;  %vm619_vm14 = vcmask 1043456  }
  0x9c   : > { %365 = vst.msk [vmem:[#allocation2] sm:$0xff] %vm364_vm15, %v360_v29  ;;  %vm657_vm15 = vcmask 1031168  }
  0x9d   : > { %v428_v30 = vpop.permute.xlu1 %427  ;;  %387 = vst.msk [vmem:[#allocation2 + $0x4] sm:$0xf] %vm386_vm0, %v384_v27  ;;  %vm731_vm0 = vcmask 891904  }
  0x9f   : > { %v406_v31 = vpop.permute.xlu0 %405 }
  0xa0   : > { %409 = vst.msk [vmem:[#allocation2 + $0x4] sm:$0xf] %vm408_vm1, %v406_v31  ;;  %vm805_vm1 = vcmask 752640  }
  0xa1   : > { %431 = vst.msk [vmem:[#allocation2 + $0x4] sm:$0xf] %vm430_vm2, %v428_v30  ;;  %v516_v32 = vpop.permute.xlu1 %515  ;;  %vm695_vm2 = vcmask 900096  }
  0xa2   : > { %v517_v34 = vrot.slane %v516_v32, 4 }
  0xa3   : > { %v450_v33 = vpop.permute.xlu0 %449 }
  0xa4   : > { %453 = vst.msk [vmem:[#allocation2 + $0x4] sm:$0xf] %vm452_vm3, %v450_v33  ;;  %v519_v37 = vsel %vm518_vm7, %v517_v34, %v516_v32  ;;  %vm769_vm3 = vcmask 883712  }
  0xa7   : > { %v472_v35 = vpop.permute.xlu0 %471 }
  0xa8   : > { %475 = vst.msk [vmem:[#allocation2 + $0x4] sm:$0xf] %vm474_vm6, %v472_v35  ;;  %v494_v36 = vpop.permute.xlu1 %493  ;;  %vm937_vm6 = vcmask 293888  }
  0xa9   : > { %497 = vst.msk [vmem:[#allocation2 + $0x4] sm:$0xf] %vm496_vm8, %v494_v36 }
  0xaa   : > { %524 = vst.msk [vmem:[#allocation2 + $0x4] sm:$0xff] %vm523_vm9, %v519_v37 }
  0xab   : > { %v543_v38 = vpop.permute.xlu0 %542 }
  0xac   : > { %546 = vst.msk [vmem:[#allocation2 + $0x8] sm:$0xf] %vm545_vm10, %v543_v38  ;;  %v565_v39 = vpop.permute.xlu1 %564 }
  0xad   : > { %568 = vst.msk [vmem:[#allocation2 + $0x8] sm:$0xf] %vm567_vm11, %v565_v39 }
  0xb1   : > { %v628_v40 = vld [vmem:[#allocation2] sm:$0xff] }
  0xb2   : > { %v632_v41 = vcombine.high %v628_v40, %v628_v40 }
  0xb4   : > { %v570_v42 = vld [vmem:[#allocation2 + $0x8] sm:$0xf]  ;;  %v1156_v43 = vpack.c.bf16 %v632_v41, %v628_v40 }
  0xb5   : > { %v629_v44 = vld [vmem:[#allocation2 + $0x8] sm:$0xff]  ;;  %v1153_v45 = vpack.c.bf16 %v570_v42, %v570_v42 }
  0xb6   : > { %v633_v46 = vcombine.high %v629_v44, %v629_v44  ;;  %650 = vrot.lane.b32.xlu0 %v1156_v43, %s1257_s11  ;;  %587 = vst [vmem:[#allocation3] sm:$0x33] %v1156_v43  ;;  %v611_v48 = vrot.slane %v1156_v43, 6 }
  0xb7   : > { %588 = vst [vmem:[#allocation3 + $0x8] sm:$0x3] %v1153_v45 }
  0xb8   : > { %v1157_v47 = vpack.c.bf16 %v633_v46, %v629_v44 }
  0xba   : > { %652 = vrot.lane.b32.xlu1 %v1157_v47, %s1257_s11  ;;  %724 = vrot.lane.b32.xlu0 %v1156_v43, %s1248_s28  ;;  %v612_v49 = vrot.slane %v1157_v47, 6 }
  0xbe   : > { %726 = vrot.lane.b32.xlu1 %v1157_v47, %s1248_s28  ;;  %798 = vrot.lane.b32.xlu0 %v1156_v43, %s1258_s12 }
  0xc2   : > { %800 = vrot.lane.b32.xlu1 %v1157_v47, %s1258_s12  ;;  %613 = vrot.lane.b32.xlu0 %v611_v48, %s1246_s26 }
  0xc6   : > { %615 = vrot.lane.b32.xlu1 %v612_v49, %s1246_s26  ;;  %688 = vrot.lane.b32.xlu0 %v611_v48, %s1259_s13 }
  0xca   : > { %690 = vrot.lane.b32.xlu1 %v612_v49, %s1259_s13  ;;  %762 = vrot.lane.b32.xlu0 %v611_v48, %s1260_s14 }
  0xce   : > { %764 = vrot.lane.b32.xlu1 %v612_v49, %s1260_s14  ;;  %836 = vrot.lane.b32.xlu0 %v611_v48, %s1245_s25 }
  0xd2   : > { %838 = vrot.lane.b32.xlu1 %v612_v49, %s1245_s25  ;;  %872 = vrot.lane.b32.xlu0 %v1156_v43, %s1261_s17 }
  0xd6   : > { %874 = vrot.lane.b32.xlu1 %v1157_v47, %s1261_s17  ;;  %1035 = vperm.xlu0 %1217, %v1032_v51  }
  0xda   : > { %1044 = vperm.xlu1 %1218, %v1041_v52  }
 0x128   : > { %v651_v53 = vpop.permute.xlu0 %650 }
 0x129   : > { %v654_v55 = vrot.slane %v651_v53, 4 }
 0x12c   : > { %v653_v54 = vpop.permute.xlu1 %652  ;;  %v725_v57 = vpop.permute.xlu0 %724 }
 0x12d   : > { %v655_v56 = vrot.slane %v653_v54, 4  ;;  %v728_v62 = vrot.slane %v725_v57, 4 }
 0x12f   : > { %v656_v58 = vsel %vm619_vm14, %v654_v55, %v655_v56  ;;  %v659_v59 = vsel %vm657_vm15, %v653_v54, %v655_v56 }
 0x130   : > { %v658_v60 = vsel %vm657_vm15, %v651_v53, %v656_v58  ;;  %663 = vst [vmem:[#allocation3 + $0x14] sm:$0x3] %v659_v59  ;;  %v727_v61 = vpop.permute.xlu1 %726  ;;  %v799_v1 = vpop.permute.xlu0 %798 }
 0x131   : > { %662 = vst [vmem:[#allocation3 + $0xc] sm:$0x33] %v658_v60  ;;  %v729_v63 = vrot.slane %v727_v61, 4  ;;  %v802_v6 = vrot.slane %v799_v1, 4 }
 0x133   : > { %v730_v2 = vsel %vm619_vm14, %v728_v62, %v729_v63  ;;  %v733_v3 = vsel %vm731_vm0, %v727_v61, %v729_v63 }
 0x134   : > { %v732_v4 = vsel %vm731_vm0, %v725_v57, %v730_v2  ;;  %737 = vst [vmem:[#allocation3 + $0x20] sm:$0x3] %v733_v3  ;;  %v801_v5 = vpop.permute.xlu1 %800  ;;  %v614_v8 = vpop.permute.xlu0 %613  ;;  %v886_v57 = vld [vmem:[%s1508_s1] sm:$0xf] }
 0x135   : > { %736 = vst [vmem:[#allocation3 + $0x18] sm:$0x33] %v732_v4  ;;  %v803_v7 = vrot.slane %v801_v5, 4  ;;  %v617_v13 = vrot.slane %v614_v8, 4 }
 0x137   : > { %v804_v9 = vsel %vm619_vm14, %v802_v6, %v803_v7  ;;  %v807_v10 = vsel %vm805_vm1, %v801_v5, %v803_v7 }
 0x138   : > { %v806_v11 = vsel %vm805_vm1, %v799_v1, %v804_v9  ;;  %811 = vst [vmem:[#allocation3 + $0x2c] sm:$0x3] %v807_v10  ;;  %v616_v12 = vpop.permute.xlu1 %615  ;;  %v689_v15 = vpop.permute.xlu0 %688 }
 0x139   : > { %810 = vst [vmem:[#allocation3 + $0x24] sm:$0x33] %v806_v11  ;;  %v618_v14 = vrot.slane %v616_v12, 4  ;;  %v692_v20 = vrot.slane %v689_v15, 4 }
 0x13b   : > { %v620_v16 = vsel %vm619_vm14, %v617_v13, %v618_v14  ;;  %v623_v17 = vsel %vm359_vm13, %v616_v12, %v618_v14 }
 0x13c   : > { %v622_v18 = vsel %vm359_vm13, %v614_v8, %v620_v16  ;;  %627 = vst [vmem:[#allocation3 + $0x8] sm:$0xc] %v623_v17  ;;  %v691_v19 = vpop.permute.xlu1 %690  ;;  %v763_v22 = vpop.permute.xlu0 %762  ;;  %vm843_vm13 = vcmask 744448  }
 0x13d   : > { %626 = vst [vmem:[#allocation3] sm:$0xcc] %v622_v18  ;;  %v693_v21 = vrot.slane %v691_v19, 4  ;;  %v766_v27 = vrot.slane %v763_v22, 4 }
 0x13f   : > { %v694_v23 = vsel %vm619_vm14, %v692_v20, %v693_v21  ;;  %v697_v24 = vsel %vm695_vm2, %v691_v19, %v693_v21 }
 0x140   : > { %v696_v25 = vsel %vm695_vm2, %v689_v15, %v694_v23  ;;  %701 = vst [vmem:[#allocation3 + $0x14] sm:$0xc] %v697_v24  ;;  %v765_v26 = vpop.permute.xlu1 %764  ;;  %v837_v29 = vpop.permute.xlu0 %836 }
 0x141   : > { %700 = vst [vmem:[#allocation3 + $0xc] sm:$0xcc] %v696_v25  ;;  %v767_v28 = vrot.slane %v765_v26, 4  ;;  %v840_v34 = vrot.slane %v837_v29, 4 }
 0x143   : > { %v768_v30 = vsel %vm619_vm14, %v766_v27, %v767_v28  ;;  %v771_v31 = vsel %vm769_vm3, %v765_v26, %v767_v28 }
 0x144   : > { %v770_v32 = vsel %vm769_vm3, %v763_v22, %v768_v30  ;;  %775 = vst [vmem:[#allocation3 + $0x20] sm:$0xc] %v771_v31  ;;  %v839_v33 = vpop.permute.xlu1 %838  ;;  %v873_v36 = vpop.permute.xlu0 %872 }
 0x145   : > { %774 = vst [vmem:[#allocation3 + $0x18] sm:$0xcc] %v770_v32  ;;  %v841_v35 = vrot.slane %v839_v33, 4  ;;  %v876_v44 = vrot.slane %v873_v36, 4 }
 0x147   : > { %v842_v37 = vsel %vm619_vm14, %v840_v34, %v841_v35  ;;  %v845_v38 = vsel %vm843_vm13, %v839_v33, %v841_v35  ;;  %v1221_v39 = vld [vmem:[#allocation3 + $0x8] ss:$12 sps:$4 sm:$0xff]  }
 0x148   : > { %v844_v40 = vsel %vm843_vm13, %v837_v29, %v842_v37  ;;  %849 = vst [vmem:[#allocation3 + $0x2c] sm:$0xc] %v845_v38  ;;  %v875_v41 = vpop.permute.xlu1 %874  ;;  %v1222_v42 = vld [vmem:[#allocation3 + $0x4] ss:$12 sps:$4 sm:$0xff]   ;;  %v1224_v43 = vld [vmem:[#allocation3] ss:$12 sps:$4 sm:$0xff]   ;;  %1175 = vmatpush3.bf16.msra.mxu1 %v1221_v39 }
 0x149   : > { %848 = vst [vmem:[#allocation3 + $0x24] sm:$0xcc] %v844_v40  ;;  %v877_v45 = vrot.slane %v875_v41, 4  ;;  %951 = vmatprep.subr.bf16.mxu0 %v1222_v42  ;;  %1176 = vmatprep.subr.bf16.mxu1 %v1240_v0 }
 0x14a   : > { %952 = vmatpush1.bf16.msra.mxu0 %v1224_v43 }
 0x14b   : > { %v878_v46 = vsel %vm619_vm14, %v876_v44, %v877_v45  ;;  %v881_v47 = vsel %vm879_vm4, %v875_v41, %v877_v45 }
 0x14c   : > { %v880_v48 = vsel %vm879_vm4, %v873_v36, %v878_v46  ;;  %885 = vst [vmem:[#allocation3 + $0x38] sm:$0x3] %v881_v47 }
 0x14d   : > { %884 = vst [vmem:[#allocation3 + $0x30] sm:$0x33] %v880_v48 }
 0x14f   : > { %v1225_v49 = vld [vmem:[#allocation3 + $0x20] ss:$12 sps:$4 sm:$0xff]  }
 0x150   : > { %v1226_v50 = vld [vmem:[#allocation3 + $0x1c] ss:$12 sps:$4 sm:$0xff]   ;;  %v1228_v51 = vld [vmem:[#allocation3 + $0x18] ss:$12 sps:$4 sm:$0xff]   ;;  %1177 = vmatpush3.bf16.msra.mxu1 %v1225_v49 }
 0x151   : > { %953 = vmatprep.subr.bf16.mxu0 %v1226_v50  ;;  %1178 = vmatprep.subr.bf16.mxu1 %v1240_v0 }
 0x152   : > { %954 = vmatpush1.bf16.msra.mxu0 %v1228_v51 }
 0x153   : > { %v1230_v52 = vld [vmem:[#allocation3 + $0x38] ss:$0 sps:$4 sm:$0x33]  }
 0x154   : > { %v895_v53 = vld [vmem:[#allocation3 + $0x30] sm:$0x33]  ;;  %v949_v55 = vsel %vm941_vm5, %v1230_v52, 0 }
 0x155   : > { %v1144_v54 = vcombine.high %v895_v53, %v895_v53  ;;  %v1143_v56 = vcombine.low %v895_v53, %v895_v53  ;;  %1179 = vmatpush3.bf16.msra.mxu1 %v949_v55  ;;  %v1036_v0 = vpop.permute.xlu0 %1035 }
 0x157   : > { %1146 = vmatprep.subr.msk.bf16.mxu0 %vm941_vm5, %v1144_v54  ;;  %v943_v58 = vsel %vm941_vm5, %v1143_v56, 0 }
 0x158   : > { %956 = vmatpush1.bf16.msra.mxu0 %v943_v58  ;;  %1181 = vmatmul.mubr.msk.bf16.vlgmr.msra.gmra.mrb[0].mxu1 %vm937_vm6, %v886_v57 }
 0x159   : > { %v1045_v60 = vpop.permute.xlu1 %1044 }
 0x15b   : > { %1147 = vmatmul.mubr.msk.bf16.vlgmr.msra.gmra.mrb[0].mxu0 %vm937_vm6, %v886_v57 }
 0x22b   : > { %v1026_v59 = vpop.f32.mrb[0].mxu1 }
 0x22c   : > { %v1182_v61 = vpop.f32.mrb[1].mxu1  ;;  %v1040_v62 = vmul.f32 %v1036_v0, %v1026_v59 }
 0x22d   : > { %v1029_v1 = vpop.f32.mrb[2].mxu1 }
 0x22e   : > { %v985_v63 = vpop.f32.mrb[0].mxu0  ;;  %v1049_v4 = vadd.f32 %v1045_v60, %v1040_v62  ;;  %v1183_v5 = vpop.f32.mrb[3].mxu1 }
 0x22f   : > { %v1038_v2 = vmul.f32 %v1036_v0, %v985_v63  ;;  %v987_v3 = vpop.f32.mrb[1].mxu0 }
 0x230   : > { %v1039_v6 = vmul.f32 %v1036_v0, %v987_v3  ;;  %v989_v7 = vpop.f32.mrb[2].mxu0  ;;  %v1052_v9 = vmax.f32 %v1049_v4, 0.0 }
 0x231   : > { %v1047_v8 = vadd.f32 %v1045_v60, %v1038_v2  ;;  %v990_v10 = vpop.f32.mrb[3].mxu0 }
 0x232   : > { %v1048_v11 = vadd.f32 %v1045_v60, %v1039_v6  ;;  %1055 = vst [vmem:[%s197_s27 + $0x10] sm:$0xff] %v1052_v9 }
 0x233   : > { %v1050_v12 = vmax.f32 %v1047_v8, 0.0 }
 0x234   : > { %v1051_v13 = vmax.f32 %v1048_v11, 0.0 }
 0x235   : > { %1053 = vst [vmem:[%s197_s27] sm:$0xff] %v1050_v12 }
 0x236   : > { %1054 = vst [vmem:[%s197_s27 + $0x8] sm:$0xff] %v1051_v13 }
 0x237 PF: > { %s14_s15 = sadd.s32 1, %s1238_s15  }
 0x238   : > { %p11_p4 = scmp.ge.s32.totalorder %s14_s15, 4  }
 0x23a   :  { %13 = sbr.rel (!%p11_p4) target bundleno = 1 (0x1), region = 66 }

// kernel: conv_block_forward.2
= control target key start
LH: loop header
LB: loop body
LE: loop exit
PB: predicated region body
PF: predicated region fallthrough
CT: control target
= control target key end

     0   :  { %s1261_s12 = smov 0   ;;  %s1476_s0 = inlined_call_operand.vmem [shape: f32[2,4,16,16], index: 0, kind: input, shape index: {}]   ;;  %s1477_s1 = inlined_call_operand.vmem [shape: bf16[8,36], index: 1, kind: input, shape index: {}]   ;;  %s1478_s2 = inlined_call_operand.vmem [shape: f32[1,384], index: 2, kind: input, shape index: {}]   ;;  %s1479_s3 = inlined_call_operand.vmem [shape: f32[2,8,2], index: 3, kind: output, shape index: {}]  }
   0x1 LB: > { %s1091_s13 = sadd.s32 4294967295, %s1215_s12   ;;  %p1095_p0 = scmp.ge.s32.totalorder %s1215_s12, 1  ;;  %s1215_s12 = sphi %s1261_s12, %s13_s12  }
   0x2   : > { %p137_p1 = scmp.lt.s32.totalorder %s1215_s12, 3 }
   0x4   : > { %p138_p2 = pnand %p1095_p0, %p137_p1 }
   0x5   : > { %p160_p3 = scmp.lt.s32.totalorder (!%p138_p2), %s1091_s13, 1  ;;  %v1217_v0 = vmov (!%p138_p2), 0.0   ;;  %vm181_vm0 = vcmask (!%p138_p2), 1041409   ;;  %vm183_vm1 = vcmask (!%p138_p2), 1045509   ;;  %vm186_vm2 = vcmask (!%p138_p2), 1042434   ;;  %s1218_s18 = smov (!%p138_p2), 55  }
   0x6   : > { %141 = sbr.rel (%p138_p2) target bundleno = 711 (0x2c7), region = 32  ;;  %170 = vst [vmem:[#allocation2] sm:$0xff] (!%p138_p2), %v1217_v0  ;;  %171 = vst [vmem:[#allocation2 + $0x8] sm:$0xff] (!%p138_p2), %v1217_v0  ;;  %1154 = vmatprep.subr.bf16.mxu1 (!%p138_p2), %v1217_v0  ;;  %vm188_vm3 = vcmask (!%p138_p2), 1046534   ;;  %vm191_vm4 = vcmask (!%p138_p2), 1043459   ;;  %vm193_vm5 = vcmask (!%p138_p2), 1047559  }
   0x7   : > { %s1219_s19 = smov (!%p138_p2), 19   ;;  %s1220_s20 = smov (!%p138_p2), 73   ;;  %vm198_vm6 = vcmask (!%p138_p2), 281752   ;;  %vm220_vm7 = vcmask (!%p138_p2), 429352   ;;  %vm242_vm8 = vcmask (!%p138_p2), 576952   ;;  %vm264_vm9 = vcmask (!%p138_p2), 724552  }
   0x8   : > { %s1221_s21 = smov (!%p138_p2), 37   ;;  %s1222_s22 = smov (!%p138_p2), 91   ;;  %vm286_vm10 = vcmask (!%p138_p2), 872152   ;;  %vm333_vm11 = vcmask (!%p138_p2), 1044472   ;;  %vm334_vm12 = vcmask (!%p138_p2), 121860   ;;  %vm330_vm13 = vcmask (!%p138_p2), 1039360  }
   0x9   : > { %s1223_s23 = smov (!%p138_p2), 127   ;;  %s1224_s24 = smov (!%p138_p2), 17   ;;  %vm308_vm14 = vcmask (!%p138_p2), 1019752   ;;  %vm335_vm15 = vmor (!%p138_p2), %vm334_vm12, %vm333_vm11  ;;  %vm538_vm11 = vcmask (!%p138_p2), 396552   ;;  %vm1240_vm12 = vmmov (!%p138_p2), 0  }
   0xa   : > { %s1225_s25 = smov (!%p138_p2), 109   ;;  %s1226_s26 = smov (!%p138_p2), 53   ;;  %1160 = vmatprep.mubr.msk.bf16.mxu1 (!%p138_p2), %vm1240_vm12, %v1217_v0 }
   0xb   : > { %s1227_s27 = smov (!%p138_p2), 35   ;;  %s1228_s28 = smov (!%p138_p2), 125  }
   0xc   : > { %s1229_s29 = smov (!%p138_p2), 71   ;;  %s1230_s30 = smov (!%p138_p2), 89  }
   0xd   : > { %s1481_s13 = smov (!%p160_p3, %s1091_s13), 1  ;;  %s1231_s4 = smov 107  }
   0xe   : > { %s1131_s14 = sshll.u32 %s1481_s13, 6  ;;  %s1232_s5 = smov 15  }
   0xf   : > { %s1278_s17 = scalar_lea.vmem %s1476_s0, %s1131_s14  ;;  %s1233_s6 = smov 33  }
  0x10   : > { %v222_v1 = vld [vmem:[%s1278_s17 + $0x2] sm:$0x1]  ;;  %v223_v2 = vld [vmem:[%s1278_s17 + $0x12] sm:$0x1]  ;;  %v172_v7 = vld [vmem:[%s1278_s17] sm:$0x1] }
  0x11   : > { %v224_v3 = vld [vmem:[%s1278_s17 + $0x22] sm:$0x1]  ;;  %v225_v4 = vld [vmem:[%s1278_s17 + $0x32] sm:$0x1]  ;;  %v230_v5 = vrot.slane %v223_v2, 7  ;;  %s1234_s7 = smov 126  }
  0x12   : > { %v233_v6 = vrot.slane %v224_v3, 6  ;;  %v236_v8 = vrot.slane %v225_v4, 5  ;;  %v173_v9 = vld [vmem:[%s1278_s17 + $0x10] sm:$0x1]  ;;  %v174_v10 = vld [vmem:[%s1278_s17 + $0x20] sm:$0x1] }
  0x13   : > { %v231_v11 = vsel %vm181_vm0, %v230_v5, %v222_v1  ;;  %v175_v12 = vld [vmem:[%s1278_s17 + $0x30] sm:$0x1]  ;;  %v180_v13 = vrot.slane %v173_v9, 7  ;;  %v185_v14 = vrot.slane %v174_v10, 6  ;;  %v244_v15 = vld [vmem:[%s1278_s17 + $0x3] sm:$0x1] }
  0x14   : > { %v232_v16 = vsel %vm183_vm1, %v230_v5, %v231_v11  ;;  %v190_v17 = vrot.slane %v175_v12, 5  ;;  %v245_v18 = vld [vmem:[%s1278_s17 + $0x13] sm:$0x1]  ;;  %v246_v19 = vld [vmem:[%s1278_s17 + $0x23] sm:$0x1]  ;;  %s1235_s8 = smov 92  }
  0x15   : > { %v234_v20 = vsel %vm186_vm2, %v233_v6, %v232_v16  ;;  %v182_v21 = vsel %vm181_vm0, %v180_v13, %v172_v7  ;;  %v247_v22 = vld [vmem:[%s1278_s17 + $0x33] sm:$0x1]  ;;  %v252_v23 = vrot.slane %v245_v18, 7  ;;  %v255_v24 = vrot.slane %v246_v19, 6  ;;  %v200_v25 = vld [vmem:[%s1278_s17 + $0x1] sm:$0x1] }
  0x16   : > { %v235_v26 = vsel %vm188_vm3, %v233_v6, %v234_v20  ;;  %v184_v27 = vsel %vm183_vm1, %v180_v13, %v182_v21  ;;  %v258_v28 = vrot.slane %v247_v22, 5  ;;  %v201_v29 = vld [vmem:[%s1278_s17 + $0x11] sm:$0x1]  ;;  %v202_v30 = vld [vmem:[%s1278_s17 + $0x21] sm:$0x1]  ;;  %s1236_s9 = smov 110  }
  0x17   : > { %v237_v31 = vsel %vm191_vm4, %v236_v8, %v235_v26  ;;  %v187_v32 = vsel %vm186_vm2, %v185_v14, %v184_v27  ;;  %v253_v33 = vsel %vm181_vm0, %v252_v23, %v244_v15  ;;  %v203_v34 = vld [vmem:[%s1278_s17 + $0x31] sm:$0x1]  ;;  %v208_v35 = vrot.slane %v201_v29, 7  ;;  %v267_v40 = vld [vmem:[%s1278_s17 + $0x14] sm:$0x1]  ;;  %s1237_s10 = smov 108  }
  0x18   : > { %v238_v36 = vsel %vm193_vm5, %v236_v8, %v237_v31  ;;  %v189_v37 = vsel %vm188_vm3, %v185_v14, %v187_v32  ;;  %v254_v38 = vsel %vm183_vm1, %v252_v23, %v253_v33  ;;  %v211_v39 = vrot.slane %v202_v30, 6  ;;  %v268_v41 = vld [vmem:[%s1278_s17 + $0x24] sm:$0x1]  ;;  %v269_v47 = vld [vmem:[%s1278_s17 + $0x34] sm:$0x1]  ;;  %s1238_s11 = smov 90  }
  0x19   : > { %239 = vrot.lane.b32.xlu1 %v238_v36, %s1218_s18  ;;  %v192_v42 = vsel %vm191_vm4, %v190_v17, %v189_v37  ;;  %v256_v43 = vsel %vm186_vm2, %v255_v24, %v254_v38  ;;  %v209_v44 = vsel %vm181_vm0, %v208_v35, %v200_v25  ;;  %v214_v45 = vrot.slane %v203_v34, 5  ;;  %v266_v46 = vld [vmem:[%s1278_s17 + $0x4] sm:$0x1]  ;;  %v311_v52 = vld [vmem:[%s1278_s17 + $0x16] sm:$0x1]  ;;  %s1098_s18 = sshll.u32 %s1481_s13, 3 }
  0x1a   : > { %v194_v48 = vsel %vm193_vm5, %v190_v17, %v192_v42  ;;  %v257_v49 = vsel %vm188_vm3, %v255_v24, %v256_v43  ;;  %v210_v50 = vsel %vm183_vm1, %v208_v35, %v209_v44  ;;  %v274_v51 = vrot.slane %v267_v40, 7  ;;  %v312_v53 = vld [vmem:[%s1278_s17 + $0x26] sm:$0x1]  ;;  %v313_v59 = vld [vmem:[%s1278_s17 + $0x36] sm:$0x1] }
  0x1b   : > { %195 = vrot.lane.b32.xlu0 %v194_v48, %s1219_s19  ;;  %v259_v54 = vsel %vm191_vm4, %v258_v28, %v257_v49  ;;  %v212_v55 = vsel %vm186_vm2, %v211_v39, %v210_v50  ;;  %v277_v56 = vrot.slane %v268_v41, 6  ;;  %v280_v57 = vrot.slane %v269_v47, 5  ;;  %v310_v58 = vld [vmem:[%s1278_s17 + $0x6] sm:$0x1]  ;;  %v338_v1 = vld [vmem:[%s1278_s17 + $0x17] sm:$0x1] }
  0x1c   : > { %v260_v60 = vsel %vm193_vm5, %v258_v28, %v259_v54  ;;  %v213_v61 = vsel %vm188_vm3, %v211_v39, %v212_v55  ;;  %v275_v62 = vsel %vm181_vm0, %v274_v51, %v266_v46  ;;  %v318_v63 = vrot.slane %v311_v52, 7  ;;  %v339_v2 = vld [vmem:[%s1278_s17 + $0x27] sm:$0x1]  ;;  %v340_v8 = vld [vmem:[%s1278_s17 + $0x37] sm:$0x1] }
  0x1d   : > { %261 = vrot.lane.b32.xlu1 %v260_v60, %s1220_s20  ;;  %v215_v3 = vsel %vm191_vm4, %v214_v45, %v213_v61  ;;  %v276_v4 = vsel %vm183_vm1, %v274_v51, %v275_v62  ;;  %v321_v5 = vrot.slane %v312_v53, 6  ;;  %v324_v6 = vrot.slane %v313_v59, 5  ;;  %v337_v7 = vld [vmem:[%s1278_s17 + $0x7] sm:$0x1]  ;;  %v289_v13 = vld [vmem:[%s1278_s17 + $0x15] sm:$0x1] }
  0x1e   : > { %v216_v9 = vsel %vm193_vm5, %v214_v45, %v215_v3  ;;  %v278_v10 = vsel %vm186_vm2, %v277_v56, %v276_v4  ;;  %v319_v11 = vsel %vm181_vm0, %v318_v63, %v310_v58  ;;  %v345_v12 = vrot.slane %v338_v1, 7  ;;  %v290_v14 = vld [vmem:[%s1278_s17 + $0x25] sm:$0x1]  ;;  %v291_v20 = vld [vmem:[%s1278_s17 + $0x35] sm:$0x1] }
  0x1f   : > { %217 = vrot.lane.b32.xlu0 %v216_v9, %s1221_s21  ;;  %v279_v15 = vsel %vm188_vm3, %v277_v56, %v278_v10  ;;  %v320_v16 = vsel %vm183_vm1, %v318_v63, %v319_v11  ;;  %v348_v17 = vrot.slane %v339_v2, 6  ;;  %v351_v18 = vrot.slane %v340_v8, 5  ;;  %v288_v19 = vld [vmem:[%s1278_s17 + $0x5] sm:$0x1]  ;;  %v382_v25 = vld [vmem:[%s1278_s17 + $0x19] sm:$0x1]  ;;  %s168_s21 = scalar_lea.vmem %s1479_s3, %s1098_s18 }
  0x20   : > { %v281_v21 = vsel %vm191_vm4, %v280_v57, %v279_v15  ;;  %v322_v22 = vsel %vm186_vm2, %v321_v5, %v320_v16  ;;  %v346_v23 = vsel %vm181_vm0, %v345_v12, %v337_v7  ;;  %v296_v24 = vrot.slane %v289_v13, 7  ;;  %v383_v30 = vld [vmem:[%s1278_s17 + $0x29] sm:$0x1]  ;;  %v384_v31 = vld [vmem:[%s1278_s17 + $0x39] sm:$0x1] }
  0x21   : > { %v282_v26 = vsel %vm193_vm5, %v280_v57, %v281_v21  ;;  %v323_v27 = vsel %vm188_vm3, %v321_v5, %v322_v22  ;;  %v347_v28 = vsel %vm183_vm1, %v345_v12, %v346_v23  ;;  %v299_v29 = vrot.slane %v290_v14, 6  ;;  %v381_v36 = vld [vmem:[%s1278_s17 + $0x9] sm:$0x1]  ;;  %v360_v37 = vld [vmem:[%s1278_s17 + $0x18] sm:$0x1] }
  0x22   : > { %283 = vrot.lane.b32.xlu1 %v282_v26, %s1222_s22  ;;  %v325_v32 = vsel %vm191_vm4, %v324_v6, %v323_v27  ;;  %v349_v33 = vsel %vm186_vm2, %v348_v17, %v347_v28  ;;  %v297_v34 = vsel %vm181_vm0, %v296_v24, %v288_v19  ;;  %v302_v35 = vrot.slane %v291_v20, 5  ;;  %v361_v42 = vld [vmem:[%s1278_s17 + $0x28] sm:$0x1]  ;;  %v362_v43 = vld [vmem:[%s1278_s17 + $0x38] sm:$0x1] }
  0x23   : > { %v326_v38 = vsel %vm193_vm5, %v324_v6, %v325_v32  ;;  %v350_v39 = vsel %vm188_vm3, %v348_v17, %v349_v33  ;;  %v298_v40 = vsel %vm183_vm1, %v296_v24, %v297_v34  ;;  %v389_v41 = vrot.slane %v382_v25, 7  ;;  %v359_v48 = vld [vmem:[%s1278_s17 + $0x8] sm:$0x1]  ;;  %v470_v49 = vld [vmem:[%s1278_s17 + $0x1d] sm:$0x1] }
  0x24   : > { %327 = vrot.lane.b32.xlu0 %v326_v38, %s1223_s23  ;;  %v352_v44 = vsel %vm191_vm4, %v351_v18, %v350_v39  ;;  %v300_v45 = vsel %vm186_vm2, %v299_v29, %v298_v40  ;;  %v392_v46 = vrot.slane %v383_v30, 6  ;;  %v395_v47 = vrot.slane %v384_v31, 5  ;;  %v471_v54 = vld [vmem:[%s1278_s17 + $0x2d] sm:$0x1]  ;;  %v472_v55 = vld [vmem:[%s1278_s17 + $0x3d] sm:$0x1] }
  0x25   : > { %v353_v50 = vsel %vm193_vm5, %v351_v18, %v352_v44  ;;  %v301_v51 = vsel %vm188_vm3, %v299_v29, %v300_v45  ;;  %v390_v52 = vsel %vm181_vm0, %v389_v41, %v381_v36  ;;  %v367_v53 = vrot.slane %v360_v37, 7  ;;  %v469_v60 = vld [vmem:[%s1278_s17 + $0xd] sm:$0x1]  ;;  %v404_v61 = vld [vmem:[%s1278_s17 + $0x1a] sm:$0x1] }
  0x26   : > { %354 = vrot.lane.b32.xlu1 %v353_v50, %s1224_s24  ;;  %v303_v56 = vsel %vm191_vm4, %v302_v35, %v301_v51  ;;  %v391_v57 = vsel %vm183_vm1, %v389_v41, %v390_v52  ;;  %v370_v58 = vrot.slane %v361_v42, 6  ;;  %v373_v59 = vrot.slane %v362_v43, 5  ;;  %v405_v3 = vld [vmem:[%s1278_s17 + $0x2a] sm:$0x1]  ;;  %v406_v9 = vld [vmem:[%s1278_s17 + $0x3a] sm:$0x1] }
  0x27   : > { %v304_v62 = vsel %vm193_vm5, %v302_v35, %v303_v56  ;;  %v393_v63 = vsel %vm186_vm2, %v392_v46, %v391_v57  ;;  %v368_v1 = vsel %vm181_vm0, %v367_v53, %v359_v48  ;;  %v477_v2 = vrot.slane %v470_v49, 7  ;;  %v403_v8 = vld [vmem:[%s1278_s17 + $0xa] sm:$0x1]  ;;  %v426_v14 = vld [vmem:[%s1278_s17 + $0x1b] sm:$0x1] }
  0x28   : > { %305 = vrot.lane.b32.xlu0 %v304_v62, %s1225_s25  ;;  %v394_v4 = vsel %vm188_vm3, %v392_v46, %v393_v63  ;;  %v369_v5 = vsel %vm183_vm1, %v367_v53, %v368_v1  ;;  %v480_v6 = vrot.slane %v471_v54, 6  ;;  %v483_v7 = vrot.slane %v472_v55, 5  ;;  %v427_v19 = vld [vmem:[%s1278_s17 + $0x2b] sm:$0x1]  ;;  %v428_v20 = vld [vmem:[%s1278_s17 + $0x3b] sm:$0x1] }
  0x29   : > { %v396_v10 = vsel %vm191_vm4, %v395_v47, %v394_v4  ;;  %v371_v11 = vsel %vm186_vm2, %v370_v58, %v369_v5  ;;  %v478_v12 = vsel %vm181_vm0, %v477_v2, %v469_v60  ;;  %v411_v13 = vrot.slane %v404_v61, 7  ;;  %v425_v25 = vld [vmem:[%s1278_s17 + $0xb] sm:$0x1]  ;;  %v448_v26 = vld [vmem:[%s1278_s17 + $0x1c] sm:$0x1] }
  0x2a   : > { %v397_v15 = vsel %vm193_vm5, %v395_v47, %v396_v10  ;;  %v372_v16 = vsel %vm188_vm3, %v370_v58, %v371_v11  ;;  %v479_v17 = vsel %vm183_vm1, %v477_v2, %v478_v12  ;;  %v414_v18 = vrot.slane %v405_v3, 6  ;;  %v449_v31 = vld [vmem:[%s1278_s17 + $0x2c] sm:$0x1]  ;;  %v450_v32 = vld [vmem:[%s1278_s17 + $0x3c] sm:$0x1] }
  0x2b   : > { %398 = vrot.lane.b32.xlu1 %v397_v15, %s1226_s26  ;;  %v374_v21 = vsel %vm191_vm4, %v373_v59, %v372_v16  ;;  %v481_v22 = vsel %vm186_vm2, %v480_v6, %v479_v17  ;;  %v412_v23 = vsel %vm181_vm0, %v411_v13, %v403_v8  ;;  %v417_v24 = vrot.slane %v406_v9, 5  ;;  %v447_v37 = vld [vmem:[%s1278_s17 + $0xc] sm:$0x1]  ;;  %v497_v38 = vld [vmem:[%s1278_s17 + $0x1e] sm:$0x1] }
  0x2c   : > { %v375_v27 = vsel %vm193_vm5, %v373_v59, %v374_v21  ;;  %v482_v28 = vsel %vm188_vm3, %v480_v6, %v481_v22  ;;  %v413_v29 = vsel %vm183_vm1, %v411_v13, %v412_v23  ;;  %v433_v30 = vrot.slane %v426_v14, 7  ;;  %v498_v43 = vld [vmem:[%s1278_s17 + $0x2e] sm:$0x1]  ;;  %v499_v44 = vld [vmem:[%s1278_s17 + $0x3e] sm:$0x1] }
  0x2d   : > { %376 = vrot.lane.b32.xlu0 %v375_v27, %s1227_s27  ;;  %v484_v33 = vsel %vm191_vm4, %v483_v7, %v482_v28  ;;  %v415_v34 = vsel %vm186_vm2, %v414_v18, %v413_v29  ;;  %v436_v35 = vrot.slane %v427_v19, 6  ;;  %v439_v36 = vrot.slane %v428_v20, 5  ;;  %v496_v49 = vld [vmem:[%s1278_s17 + $0xe] sm:$0x1]  ;;  %v519_v50 = vld [vmem:[%s1278_s17 + $0x1f] sm:$0x1] }
  0x2e   : > { %v485_v39 = vsel %vm193_vm5, %v483_v7, %v484_v33  ;;  %v416_v40 = vsel %vm188_vm3, %v414_v18, %v415_v34  ;;  %v434_v41 = vsel %vm181_vm0, %v433_v30, %v425_v25  ;;  %v455_v42 = vrot.slane %v448_v26, 7  ;;  %v520_v55 = vld [vmem:[%s1278_s17 + $0x2f] sm:$0x1]  ;;  %v521_v61 = vld [vmem:[%s1278_s17 + $0x3f] sm:$0x1] }
  0x2f   : > { %486 = vrot.lane.b32.xlu1 %v485_v39, %s1228_s28  ;;  %v418_v45 = vsel %vm191_vm4, %v417_v24, %v416_v40  ;;  %v435_v46 = vsel %vm183_vm1, %v433_v30, %v434_v41  ;;  %v458_v47 = vrot.slane %v449_v31, 6  ;;  %v461_v48 = vrot.slane %v450_v32, 5  ;;  %v518_v60 = vld [vmem:[%s1278_s17 + $0xf] sm:$0x1] }
  0x30   : > { %v419_v51 = vsel %vm193_vm5, %v417_v24, %v418_v45  ;;  %v437_v52 = vsel %vm186_vm2, %v436_v35, %v435_v46  ;;  %v456_v53 = vsel %vm181_vm0, %v455_v42, %v447_v37  ;;  %v504_v54 = vrot.slane %v497_v38, 7 }
  0x31   : > { %420 = vrot.lane.b32.xlu0 %v419_v51, %s1229_s29  ;;  %v438_v56 = vsel %vm188_vm3, %v436_v35, %v437_v52  ;;  %v457_v57 = vsel %vm183_vm1, %v455_v42, %v456_v53  ;;  %v507_v58 = vrot.slane %v498_v43, 6  ;;  %v510_v59 = vrot.slane %v499_v44, 5 }
  0x32   : > { %v440_v62 = vsel %vm191_vm4, %v439_v36, %v438_v56  ;;  %v459_v63 = vsel %vm186_vm2, %v458_v47, %v457_v57  ;;  %v505_v1 = vsel %vm181_vm0, %v504_v54, %v496_v49  ;;  %v526_v2 = vrot.slane %v519_v50, 7 }
  0x33   : > { %v441_v3 = vsel %vm193_vm5, %v439_v36, %v440_v62  ;;  %v460_v4 = vsel %vm188_vm3, %v458_v47, %v459_v63  ;;  %v506_v5 = vsel %vm183_vm1, %v504_v54, %v505_v1  ;;  %v529_v6 = vrot.slane %v520_v55, 6 }
  0x34   : > { %v462_v7 = vsel %vm191_vm4, %v461_v48, %v460_v4  ;;  %v508_v8 = vsel %vm186_vm2, %v507_v58, %v506_v5  ;;  %v527_v9 = vsel %vm181_vm0, %v526_v2, %v518_v60  ;;  %v532_v10 = vrot.slane %v521_v61, 5 }
  0x35   : > { %442 = vrot.lane.b32.xlu0 %v441_v3, %s1230_s30  ;;  %v463_v11 = vsel %vm193_vm5, %v461_v48, %v462_v7  ;;  %v509_v12 = vsel %vm188_vm3, %v507_v58, %v508_v8  ;;  %v528_v13 = vsel %vm183_vm1, %v526_v2, %v527_v9  ;;  %vm357_vm0 = vcmask 265352  }
  0x36   : > { %464 = vrot.lane.b32.xlu1 %v463_v11, %s1231_s4  ;;  %v511_v14 = vsel %vm191_vm4, %v510_v59, %v509_v12  ;;  %v530_v15 = vsel %vm186_vm2, %v529_v6, %v528_v13  ;;  %vm379_vm1 = vcmask 412952   ;;  %vm401_vm2 = vcmask 560552  }
  0x37   : > { %v512_v16 = vsel %vm193_vm5, %v510_v59, %v511_v14  ;;  %v531_v17 = vsel %vm188_vm3, %v529_v6, %v530_v15  ;;  %vm423_vm3 = vcmask 708152   ;;  %v1239_v50 = vmov 0  }
  0x38   : > { %v533_v18 = vsel %vm191_vm4, %v532_v10, %v531_v17  ;;  %vm492_vm4 = vcmask 1044456   ;;  %954 = vmatprep.mubr.bf16.mxu0 %v1239_v50 }
  0x39   : > { %513 = vrot.lane.b32.xlu0 %v512_v16, %s1232_s5  ;;  %v534_v19 = vsel %vm193_vm5, %v532_v10, %v533_v18  ;;  %vm493_vm5 = vcmask 105476  }
  0x3a   : > { %535 = vrot.lane.b32.xlu1 %v534_v19, %s1233_s6 }
  0x8b   : > { %v240_v20 = vpop.permute.xlu1 %239 }
  0x8d   : > { %v196_v21 = vpop.permute.xlu0 %195 }
  0x8e   : > { %199 = vst.msk [vmem:[#allocation2] sm:$0xf] %vm198_vm6, %v196_v21  ;;  %vm445_vm6 = vcmask 855752  }
  0x8f   : > { %v262_v22 = vpop.permute.xlu1 %261 }
  0x91   : > { %v218_v23 = vpop.permute.xlu0 %217 }
  0x92   : > { %221 = vst.msk [vmem:[#allocation2] sm:$0xf] %vm220_vm7, %v218_v23  ;;  %vm489_vm7 = vcmask 1022976  }
  0x93   : > { %243 = vst.msk [vmem:[#allocation2] sm:$0xf] %vm242_vm8, %v240_v20  ;;  %vm467_vm8 = vcmask 1003352  }
  0x94   : > { %v284_v24 = vpop.permute.xlu1 %283  ;;  %265 = vst.msk [vmem:[#allocation2] sm:$0xf] %vm264_vm9, %v262_v22  ;;  %vm494_vm9 = vmor %vm493_vm5, %vm492_vm4  ;;  %vm850_vm4 = vcmask 736256   ;;  %vm912_vm5 = vcmask 1041408  }
  0x95   : > { %287 = vst.msk [vmem:[#allocation2] sm:$0xf] %vm286_vm10, %v284_v24  ;;  %vm516_vm10 = vcmask 248952  }
  0x96   : > { %v328_v25 = vpop.permute.xlu0 %327 }
  0x97   : > { %v329_v26 = vrot.slane %v328_v25, 4 }
  0x98   : > { %v355_v27 = vpop.permute.xlu1 %354 }
  0x99   : > { %v331_v29 = vsel %vm330_vm13, %v329_v26, %v328_v25 }
  0x9a   : > { %v306_v28 = vpop.permute.xlu0 %305 }
  0x9b   : > { %309 = vst.msk [vmem:[#allocation2] sm:$0xf] %vm308_vm14, %v306_v28  ;;  %vm590_vm14 = vcmask 1043456  }
  0x9c   : > { %336 = vst.msk [vmem:[#allocation2] sm:$0xff] %vm335_vm15, %v331_v29  ;;  %vm628_vm15 = vcmask 1031168  }
  0x9d   : > { %v399_v30 = vpop.permute.xlu1 %398  ;;  %358 = vst.msk [vmem:[#allocation2 + $0x4] sm:$0xf] %vm357_vm0, %v355_v27  ;;  %vm702_vm0 = vcmask 891904  }
  0x9f   : > { %v377_v31 = vpop.permute.xlu0 %376 }
  0xa0   : > { %380 = vst.msk [vmem:[#allocation2 + $0x4] sm:$0xf] %vm379_vm1, %v377_v31  ;;  %vm776_vm1 = vcmask 752640  }
  0xa1   : > { %402 = vst.msk [vmem:[#allocation2 + $0x4] sm:$0xf] %vm401_vm2, %v399_v30  ;;  %v487_v32 = vpop.permute.xlu1 %486  ;;  %vm666_vm2 = vcmask 900096  }
  0xa2   : > { %v488_v34 = vrot.slane %v487_v32, 4 }
  0xa3   : > { %v421_v33 = vpop.permute.xlu0 %420 }
  0xa4   : > { %424 = vst.msk [vmem:[#allocation2 + $0x4] sm:$0xf] %vm423_vm3, %v421_v33  ;;  %v490_v37 = vsel %vm489_vm7, %v488_v34, %v487_v32  ;;  %vm740_vm3 = vcmask 883712   ;;  %vm1027_vm7 = vcmask 7168  }
  0xa7   : > { %v443_v35 = vpop.permute.xlu0 %442 }
  0xa8   : > { %446 = vst.msk [vmem:[#allocation2 + $0x4] sm:$0xf] %vm445_vm6, %v443_v35  ;;  %v465_v36 = vpop.permute.xlu1 %464  ;;  %vm908_vm6 = vcmask 293888  }
  0xa9   : > { %468 = vst.msk [vmem:[#allocation2 + $0x4] sm:$0xf] %vm467_vm8, %v465_v36  ;;  %vm1036_vm8 = vcmask 15368  }
  0xaa   : > { %495 = vst.msk [vmem:[#allocation2 + $0x4] sm:$0xff] %vm494_vm9, %v490_v37 }
  0xab   : > { %v514_v38 = vpop.permute.xlu0 %513 }
  0xac   : > { %517 = vst.msk [vmem:[#allocation2 + $0x8] sm:$0xf] %vm516_vm10, %v514_v38  ;;  %v536_v39 = vpop.permute.xlu1 %535 }
  0xad   : > { %539 = vst.msk [vmem:[#allocation2 + $0x8] sm:$0xf] %vm538_vm11, %v536_v39 }
  0xb1   : > { %v599_v40 = vld [vmem:[#allocation2] sm:$0xff] }
  0xb2   : > { %v603_v41 = vcombine.high %v599_v40, %v599_v40 }
  0xb4   : > { %v541_v42 = vld [vmem:[#allocation2 + $0x8] sm:$0xf]  ;;  %v1136_v43 = vpack.c.bf16 %v603_v41, %v599_v40 }
  0xb5   : > { %v600_v44 = vld [vmem:[#allocation2 + $0x8] sm:$0xff]  ;;  %v1133_v45 = vpack.c.bf16 %v541_v42, %v541_v42 }
  0xb6   : > { %v604_v46 = vcombine.high %v600_v44, %v600_v44  ;;  %621 = vrot.lane.b32.xlu0 %v1136_v43, %s1234_s7  ;;  %558 = vst [vmem:[#allocation3] sm:$0x33] %v1136_v43  ;;  %v582_v48 = vrot.slane %v1136_v43, 6 }
  0xb7   : > { %559 = vst [vmem:[#allocation3 + $0x8] sm:$0x3] %v1133_v45 }
  0xb8   : > { %v1137_v47 = vpack.c.bf16 %v604_v46, %v600_v44 }
  0xba   : > { %623 = vrot.lane.b32.xlu1 %v1137_v47, %s1234_s7  ;;  %695 = vrot.lane.b32.xlu0 %v1136_v43, %s1225_s25  ;;  %v583_v49 = vrot.slane %v1137_v47, 6 }
  0xbe   : > { %697 = vrot.lane.b32.xlu1 %v1137_v47, %s1225_s25  ;;  %769 = vrot.lane.b32.xlu0 %v1136_v43, %s1235_s8 }
  0xc2   : > { %771 = vrot.lane.b32.xlu1 %v1137_v47, %s1235_s8  ;;  %584 = vrot.lane.b32.xlu0 %v582_v48, %s1223_s23 }
  0xc6   : > { %586 = vrot.lane.b32.xlu1 %v583_v49, %s1223_s23  ;;  %659 = vrot.lane.b32.xlu0 %v582_v48, %s1236_s9 }
  0xca   : > { %661 = vrot.lane.b32.xlu1 %v583_v49, %s1236_s9  ;;  %733 = vrot.lane.b32.xlu0 %v582_v48, %s1237_s10 }
  0xce   : > { %735 = vrot.lane.b32.xlu1 %v583_v49, %s1237_s10  ;;  %807 = vrot.lane.b32.xlu0 %v582_v48, %s1222_s22 }
  0xd2   : > { %809 = vrot.lane.b32.xlu1 %v583_v49, %s1222_s22  ;;  %843 = vrot.lane.b32.xlu0 %v1136_v43, %s1238_s11 }
  0xd6   : > { %845 = vrot.lane.b32.xlu1 %v1137_v47, %s1238_s11 }
 0x128   : > { %v622_v51 = vpop.permute.xlu0 %621 }
 0x129   : > { %v625_v53 = vrot.slane %v622_v51, 4 }
 0x12c   : > { %v624_v52 = vpop.permute.xlu1 %623  ;;  %v696_v55 = vpop.permute.xlu0 %695 }
 0x12d   : > { %v626_v54 = vrot.slane %v624_v52, 4  ;;  %v699_v60 = vrot.slane %v696_v55, 4 }
 0x12f   : > { %v627_v56 = vsel %vm590_vm14, %v625_v53, %v626_v54  ;;  %v630_v57 = vsel %vm628_vm15, %v624_v52, %v626_v54 }
 0x130   : > { %v629_v58 = vsel %vm628_vm15, %v622_v51, %v627_v56  ;;  %634 = vst [vmem:[#allocation3 + $0x14] sm:$0x3] %v630_v57  ;;  %v698_v59 = vpop.permute.xlu1 %697  ;;  %v770_v62 = vpop.permute.xlu0 %769  ;;  %v1005_v57 = vlaneseq }
 0x131   : > { %633 = vst [vmem:[#allocation3 + $0xc] sm:$0x33] %v629_v58  ;;  %v700_v61 = vrot.slane %v698_v59, 4  ;;  %v773_v4 = vrot.slane %v770_v62, 4 }
 0x133   : > { %v701_v63 = vsel %vm590_vm14, %v699_v60, %v700_v61  ;;  %v704_v1 = vsel %vm702_vm0, %v698_v59, %v700_v61  ;;  %v1003_v59 = vld [vmem:[%s1478_s2] sm:$0x7] }
 0x134   : > { %v703_v2 = vsel %vm702_vm0, %v696_v55, %v701_v63  ;;  %708 = vst [vmem:[#allocation3 + $0x20] sm:$0x3] %v704_v1  ;;  %v772_v3 = vpop.permute.xlu1 %771  ;;  %v585_v6 = vpop.permute.xlu0 %584  ;;  %v857_v55 = vld [vmem:[%s1477_s1] sm:$0xf] }
 0x135   : > { %707 = vst [vmem:[#allocation3 + $0x18] sm:$0x33] %v703_v2  ;;  %v774_v5 = vrot.slane %v772_v3, 4  ;;  %v588_v11 = vrot.slane %v585_v6, 4 }
 0x137   : > { %v775_v7 = vsel %vm590_vm14, %v773_v4, %v774_v5  ;;  %v778_v8 = vsel %vm776_vm1, %v772_v3, %v774_v5 }
 0x138   : > { %v777_v9 = vsel %vm776_vm1, %v770_v62, %v775_v7  ;;  %782 = vst [vmem:[#allocation3 + $0x2c] sm:$0x3] %v778_v8  ;;  %v587_v10 = vpop.permute.xlu1 %586  ;;  %v660_v13 = vpop.permute.xlu0 %659 }
 0x139   : > { %781 = vst [vmem:[#allocation3 + $0x24] sm:$0x33] %v777_v9  ;;  %v589_v12 = vrot.slane %v587_v10, 4  ;;  %v663_v18 = vrot.slane %v660_v13, 4 }
 0x13b   : > { %v591_v14 = vsel %vm590_vm14, %v588_v11, %v589_v12  ;;  %v594_v15 = vsel %vm330_vm13, %v587_v10, %v589_v12 }
 0x13c   : > { %v593_v16 = vsel %vm330_vm13, %v585_v6, %v591_v14  ;;  %598 = vst [vmem:[#allocation3 + $0x8] sm:$0xc] %v594_v15  ;;  %v662_v17 = vpop.permute.xlu1 %661  ;;  %v734_v20 = vpop.permute.xlu0 %733  ;;  %vm814_vm13 = vcmask 744448  }
 0x13d   : > { %597 = vst [vmem:[#allocation3] sm:$0xcc] %v593_v16  ;;  %v664_v19 = vrot.slane %v662_v17, 4  ;;  %v737_v25 = vrot.slane %v734_v20, 4 }
 0x13f   : > { %v665_v21 = vsel %vm590_vm14, %v663_v18, %v664_v19  ;;  %v668_v22 = vsel %vm666_vm2, %v662_v17, %v664_v19 }
 0x140   : > { %v667_v23 = vsel %vm666_vm2, %v660_v13, %v665_v21  ;;  %672 = vst [vmem:[#allocation3 + $0x14] sm:$0xc] %v668_v22  ;;  %v736_v24 = vpop.permute.xlu1 %735  ;;  %v808_v27 = vpop.permute.xlu0 %807 }
 0x141   : > { %671 = vst [vmem:[#allocation3 + $0xc] sm:$0xcc] %v667_v23  ;;  %v738_v26 = vrot.slane %v736_v24, 4  ;;  %v811_v32 = vrot.slane %v808_v27, 4 }
 0x143   : > { %v739_v28 = vsel %vm590_vm14, %v737_v25, %v738_v26  ;;  %v742_v29 = vsel %vm740_vm3, %v736_v24, %v738_v26 }
 0x144   : > { %v741_v30 = vsel %vm740_vm3, %v734_v20, %v739_v28  ;;  %746 = vst [vmem:[#allocation3 + $0x20] sm:$0xc] %v742_v29  ;;  %v810_v31 = vpop.permute.xlu1 %809  ;;  %v844_v34 = vpop.permute.xlu0 %843 }
 0x145   : > { %745 = vst [vmem:[#allocation3 + $0x18] sm:$0xcc] %v741_v30  ;;  %v812_v33 = vrot.slane %v810_v31, 4  ;;  %v847_v42 = vrot.slane %v844_v34, 4 }
 0x147   : > { %v813_v35 = vsel %vm590_vm14, %v811_v32, %v812_v33  ;;  %v816_v36 = vsel %vm814_vm13, %v810_v31, %v812_v33  ;;  %v1198_v37 = vld [vmem:[#allocation3 + $0x8] ss:$12 sps:$4 sm:$0xff]  }
 0x148   : > { %v815_v38 = vsel %vm814_vm13, %v808_v27, %v813_v35  ;;  %820 = vst [vmem:[#allocation3 + $0x2c] sm:$0xc] %v816_v36  ;;  %v846_v39 = vpop.permute.xlu1 %845  ;;  %v1199_v40 = vld [vmem:[#allocation3 + $0x4] ss:$12 sps:$4 sm:$0xff]   ;;  %v1201_v41 = vld [vmem:[#allocation3] ss:$12 sps:$4 sm:$0xff]   ;;  %1155 = vmatpush3.bf16.msra.mxu1 %v1198_v37 }
 0x149   : > { %819 = vst [vmem:[#allocation3 + $0x24] sm:$0xcc] %v815_v38  ;;  %v848_v43 = vrot.slane %v846_v39, 4  ;;  %922 = vmatprep.subr.bf16.mxu0 %v1199_v40  ;;  %1156 = vmatprep.subr.bf16.mxu1 %v1217_v0 }
 0x14a   : > { %923 = vmatpush1.bf16.msra.mxu0 %v1201_v41 }
 0x14b   : > { %v849_v44 = vsel %vm590_vm14, %v847_v42, %v848_v43  ;;  %v852_v45 = vsel %vm850_vm4, %v846_v39, %v848_v43 }
 0x14c   : > { %v851_v46 = vsel %vm850_vm4, %v844_v34, %v849_v44  ;;  %856 = vst [vmem:[#allocation3 + $0x38] sm:$0x3] %v852_v45 }
 0x14d   : > { %855 = vst [vmem:[#allocation3 + $0x30] sm:$0x33] %v851_v46 }
 0x14f   : > { %v1202_v47 = vld [vmem:[#allocation3 + $0x20] ss:$12 sps:$4 sm:$0xff]  }
 0x150   : > { %v1203_v48 = vld [vmem:[#allocation3 + $0x1c] ss:$12 sps:$4 sm:$0xff]   ;;  %v1205_v49 = vld [vmem:[#allocation3 + $0x18] ss:$12 sps:$4 sm:$0xff]   ;;  %1157 = vmatpush3.bf16.msra.mxu1 %v1202_v47 }
 0x151   : > { %924 = vmatprep.subr.bf16.mxu0 %v1203_v48  ;;  %1158 = vmatprep.subr.bf16.mxu1 %v1217_v0  ;;  %v1006_v0 = vshrl.u32 %v1005_v57, 7 }
 0x152   : > { %925 = vmatpush1.bf16.msra.mxu0 %v1205_v49 }
 0x153   : > { %v1207_v50 = vld [vmem:[#allocation3 + $0x38] ss:$0 sps:$4 sm:$0x33]   ;;  %v1007_v58 = vsub.s32 0, %v1006_v0  ;;  %v1015_v60 = vsub.s32 2, %v1006_v0  ;;  %v1011_v61 = vsub.s32 1, %v1006_v0 }
 0x154   : > { %v866_v51 = vld [vmem:[#allocation3 + $0x30] sm:$0x33]  ;;  %v920_v53 = vsel %vm912_vm5, %v1207_v50, 0 }
 0x155   : > { %v1124_v52 = vcombine.high %v866_v51, %v866_v51  ;;  %v1123_v54 = vcombine.low %v866_v51, %v866_v51  ;;  %1159 = vmatpush3.bf16.msra.mxu1 %v920_v53  ;;  %v1008_v62 = vrot.slane %v1003_v59, %v1007_v58  ;;  %v1016_v1 = vrot.slane %v1003_v59, %v1015_v60 }
 0x156   : > { %v1012_v2 = vrot.slane %v1003_v59, %v1011_v61 }
 0x157   : > { %1126 = vmatprep.subr.msk.bf16.mxu0 %vm912_vm5, %v1124_v52  ;;  %v914_v56 = vsel %vm912_vm5, %v1123_v54, 0 }
 0x158   : > { %927 = vmatpush1.bf16.msra.mxu0 %v914_v56  ;;  %1161 = vmatmul.mubr.msk.bf16.vlgmr.msra.gmra.mrb[0].mxu1 %vm908_vm6, %v857_v55 }
 0x15b   : > { %1127 = vmatmul.mubr.msk.bf16.vlgmr.msra.gmra.mrb[0].mxu0 %vm908_vm6, %v857_v55 }
 0x22b   : > { %v997_v63 = vpop.f32.mrb[0].mxu1 }
 0x22c   : > { %v1162_v3 = vpop.f32.mrb[1].mxu1  ;;  %v1022_v9 = vmul.f32 %v1016_v1, %v997_v63 }
 0x22d   : > { %v1000_v5 = vpop.f32.mrb[2].mxu1 }
 0x22e   : > { %v956_v4 = vpop.f32.mrb[0].mxu0  ;;  %v1163_v8 = vpop.f32.mrb[3].mxu1  ;;  %v1031_v16 = vmul.f32 %v1022_v9, %v997_v63 }
 0x22f   : > { %v1020_v6 = vmul.f32 %v1008_v62, %v956_v4  ;;  %v958_v7 = vpop.f32.mrb[1].mxu0 }
 0x230   : > { %v1021_v10 = vmul.f32 %v1012_v2, %v958_v7  ;;  %v960_v11 = vpop.f32.mrb[2].mxu0 }
 0x231   : > { %v1029_v12 = vmul.f32 %v1020_v6, %v956_v4  ;;  %v961_v13 = vpop.f32.mrb[3].mxu0 }
 0x232   : > { %v1030_v14 = vmul.f32 %v1021_v10, %v958_v7  ;;  %v1023_v15 = vadd.f32 %v1021_v10, %v1020_v6 }
 0x234   : > { %v1024_v17 = vadd.f32 %v1023_v15, %v1022_v9  ;;  %v1032_v18 = vadd.f32 %v1030_v14, %v1029_v12 }
 0x236   : > { %1025 = vadd.xlane.f32.xlu0 %v1024_v17  ;;  %v1033_v19 = vadd.f32 %v1032_v18, %v1031_v16 }
 0x238   : > { %1034 = vadd.xlane.f32.xlu1 %v1033_v19 }
 0x2c3   : > { %v1026_v20 = vpop.xlane.xlu0 %1025 }
 0x2c4   : > { %1028 = vst.msk [vmem:[%s168_s21] sm:$0xff] %vm1027_vm7, %v1026_v20 }
 0x2c5   : > { %v1035_v21 = vpop.xlane.xlu1 %1034 }
 0x2c6   : > { %1037 = vst.msk [vmem:[%s168_s21] sm:$0xff] %vm1036_vm8, %v1035_v21 }
 0x2c7 PF: > { %s13_s12 = sadd.s32 1, %s1215_s12  }
 0x2c8   : > { %p10_p4 = scmp.ge.s32.totalorder %s13_s12, 4  }
 0x2ca   :  { %12 = sbr.rel (!%p10_p4) target bundleno = 1 (0x1), region = 62 }

</bundles_post_ra>
